<compile_context>
chip_gen: v7x
topology: tpu7x:2x2x1
jax: 0.10.0
libtpu: 0.0.40
codegen_flags: <defaults>
</compile_context>

<pallas_src>
import functools

import numpy as np

import jax
import jax.numpy as jnp
from jax import lax
from jax.experimental import pallas as pl
from jax.experimental.pallas import tpu as pltpu


def _make_kernel(k, d, h, w):
    """Kernel closed over the static problem dims.

    Per grid step (one batch element):
      x_ref     : (1, Cin_p, S)     channels on sublanes, S = D*H*W on lanes
      w_ref     : (k^3, Cout, Cin_p) per-tap weight blocks
      b_ref     : (Cout, 1)
      scale_ref : (1, S)            valid-lane mask / (Do*Ho*Wo)
      out_ref   : (1, 1, Cout)
    """
    s = d * h * w
    hw = h * w

    def kernel(x_ref, w_ref, b_ref, scale_ref, out_ref):
        x8 = x_ref[0]                                   # (Cin_p, S)

        # Conv3d via k^3 lane-rolled taps: output lane s0 = do*HW + ho*W + wo
        # reads input lane s0 + (kd*HW + kh*W + kw).  Roll left by that shift
        # (wrap-around only lands in masked-out lanes) and contract the
        # zero-padded channel dim (8 = one sublane tile) on the MXU.
        acc = None
        for kd in range(k):
            for kh in range(k):
                for kw in range(k):
                    j = (kd * k + kh) * k + kw
                    shift = kd * hw + kh * w + kw
                    xs = x8 if shift == 0 else pltpu.roll(x8, s - shift, axis=1)
                    part = jnp.dot(w_ref[j], xs,
                                   preferred_element_type=jnp.float32)
                    acc = part if acc is None else acc + part
        conv = acc + b_ref[...]                          # (Cout, S)

        # fused hardswish -> ReLU (matches the reference CUDA kernel)
        relu6 = jnp.clip(conv + 3.0, 0.0, 6.0)
        act = jnp.maximum(conv * relu6 * (1.0 / 6.0), 0.0)

        # softmax over channels == sublane axis (per spatial column).  Garbage
        # (rolled-in) columns stay finite and are excluded by scale_ref below.
        mx = jnp.max(act, axis=0, keepdims=True)         # (1, S)
        e = jnp.exp(act - mx)                            # (Cout, S)
        denom = jnp.sum(e, axis=0, keepdims=True)        # (1, S)

        # Fold 1/denom, the valid-window mask and the 1/(Do*Ho*Wo) of the
        # spatial mean into a single row; the lane contraction against e emits
        # the result directly as a (1, Cout) row => no transpose anywhere.
        lhs = scale_ref[...] * pl.reciprocal(denom, approx=False)   # (1, S)
        res = lax.dot_general(lhs, e, (((1,), (1,)), ((), ())),
                              preferred_element_type=jnp.float32)   # (1, Cout)
        out_ref[0] = res.astype(out_ref.dtype)

    return kernel


@functools.partial(jax.jit, static_argnames=("kernel_size",))
def model_forward(x, weight, bias, kernel_size=3):
    """x: (N, Cin, D, H, W) f32; weight: (Cout, Cin, k, k, k); bias: (Cout,)."""
    n, cin, d, h, w = x.shape
    cout = weight.shape[0]
    k = kernel_size
    k3 = k * k * k
    s = d * h * w
    do, ho, wo = d - k + 1, h - k + 1, w - k + 1
    cin_p = ((cin + 7) // 8) * 8        # pad channels to one sublane tile (3 -> 8)

    # Input rows: free reshape + tiny channel zero-pad (keeps every tap
    # contraction tile-aligned; ~20 KiB extra vs the ~220 KiB im2col this
    # version removed).
    x_rows = jnp.pad(x.reshape(n, cin, s).astype(jnp.float32),
                     ((0, 0), (0, cin_p - cin), (0, 0)))

    # Per-tap weight blocks (k^3, Cout, Cin_p), tap index j = (kd*k + kh)*k + kw.
    w_taps = jnp.transpose(weight.astype(jnp.float32),
                           (2, 3, 4, 0, 1)).reshape(k3, cout, cin)
    w_taps = jnp.pad(w_taps, ((0, 0), (0, 0), (0, cin_p - cin)))
    b_col = bias.astype(jnp.float32).reshape(cout, 1)

    # Valid-output-lane mask with the 1/(Do*Ho*Wo) of the spatial mean folded
    # in; built with numpy -> baked in as a jit constant (no runtime op).
    lanes = np.arange(s)
    d_i, rem = lanes // (h * w), lanes % (h * w)
    h_i, w_i = rem // w, rem % w
    valid = (d_i < do) & (h_i < ho) & (w_i < wo)
    scale_row = jnp.asarray(
        (valid.astype(np.float32) / float(do * ho * wo)).reshape(1, s))

    kernel = _make_kernel(k, d, h, w)
    out = pl.pallas_call(
        kernel,
        out_shape=jax.ShapeDtypeStruct((n, 1, cout), jnp.float32),
        grid=(n,),
        in_specs=[
            pl.BlockSpec((1, cin_p, s), lambda i: (i, 0, 0)),     # one batch row
            pl.BlockSpec((k3, cout, cin_p), lambda i: (0, 0, 0)),  # weights
            pl.BlockSpec((cout, 1), lambda i: (0, 0)),             # bias
            pl.BlockSpec((1, s), lambda i: (0, 0)),                # mask/scale
        ],
        out_specs=pl.BlockSpec((1, 1, cout), lambda i: (i, 0, 0)),
        compiler_params=pltpu.CompilerParams(
            dimension_semantics=("parallel",)),   # 2 TCs on v7x, pipeline elsewhere
    )(x_rows, w_taps, b_col, scale_row)

    return out.reshape(n, cout)


def _reference(x, weight, bias):
    # Independent pure-JAX reference (XLA conv at full precision).
    conv = lax.conv_general_dilated(
        x, weight, window_strides=(1, 1, 1), padding="VALID",
        dimension_numbers=("NCDHW", "OIDHW", "NCDHW"),
        precision=lax.Precision.HIGHEST)
    conv = conv + bias[None, :, None, None, None]
    relu6 = jnp.clip(conv + 3.0, 0.0, 6.0)
    act = jnp.maximum(conv * relu6 / 6.0, 0.0)
    sm = jax.nn.softmax(act, axis=1)
    return jnp.mean(sm, axis=(2, 3, 4))


if __name__ == "__main__":
    key = jax.random.PRNGKey(0)
    k_x, k_w, k_b = jax.random.split(key, 3)

    in_channels, out_channels, kernel_size = 3, 16, 3
    N, D, H, W = 2, 8, 8, 8

    x = jax.random.normal(k_x, (N, in_channels, D, H, W), dtype=jnp.float32)
    fan_in = in_channels * kernel_size ** 3
    bound = 1.0 / (fan_in ** 0.5)
    weight = jax.random.uniform(
        k_w, (out_channels, in_channels, kernel_size, kernel_size, kernel_size),
        minval=-bound, maxval=bound, dtype=jnp.float32)
    bias = jax.random.uniform(
        k_b, (out_channels,), minval=-bound, maxval=bound, dtype=jnp.float32)

    out = model_forward(x, weight, bias, kernel_size=kernel_size)
    out = jax.block_until_ready(out)

    ref = _reference(x, weight, bias)
    assert out.shape == (N, out_channels)
    max_err = float(jnp.max(jnp.abs(out - ref)))
    assert jnp.allclose(out, ref, atol=1e-4, rtol=1e-4), (
        f"mismatch vs reference (max abs err {max_err})")

    print("KERNEL_OK")
</pallas_src>

<mosaic_0001>
module attributes {stable_mosaic.version = 11 : i64} {
  func.func @kernel(%arg0: i32, %arg1: memref<1x8x512xf32, #tpu.memory_space<vmem>>, %arg2: memref<27x16x8xf32, #tpu.memory_space<vmem>>, %arg3: memref<16x1xf32, #tpu.memory_space<vmem>>, %arg4: memref<1x512xf32, #tpu.memory_space<vmem>>, %arg5: memref<1x1x16xf32, #tpu.memory_space<vmem>>) attributes {dimension_semantics = [#tpu.dimension_semantics<parallel>], iteration_bounds = array<i64: 2>, scalar_prefetch = 0 : i64, scratch_operands = 0 : i64, tpu.core_type = #tpu.core_type<tc>, window_params = [{transform_indices = @transform_0, window_bounds = array<i64: 1, 8, 512>}, {pipeline_mode = #tpu.pipeline_mode<synchronous>, transform_indices = @transform_1, window_bounds = array<i64: 27, 16, 8>}, {pipeline_mode = #tpu.pipeline_mode<synchronous>, transform_indices = @transform_2, window_bounds = array<i64: 16, 1>}, {pipeline_mode = #tpu.pipeline_mode<synchronous>, transform_indices = @transform_3, window_bounds = array<i64: 1, 512>}, {transform_indices = @transform_4, window_bounds = array<i64: 1, 1, 16>}]} {
    %c0 = arith.constant 0 : index
    %c0_0 = arith.constant 0 : index
    %c0_1 = arith.constant 0 : index
    %0 = vector.load %arg1[%c0, %c0_0, %c0_1] : memref<1x8x512xf32, #tpu.memory_space<vmem>>, vector<1x8x512xf32>
    %1 = vector.shape_cast %0 : vector<1x8x512xf32> to vector<8x512xf32>
    %c0_2 = arith.constant 0 : index
    %c0_3 = arith.constant 0 : index
    %c0_4 = arith.constant 0 : index
    %2 = vector.load %arg2[%c0_2, %c0_3, %c0_4] : memref<27x16x8xf32, #tpu.memory_space<vmem>>, vector<1x16x8xf32>
    %3 = vector.shape_cast %2 : vector<1x16x8xf32> to vector<16x8xf32>
    %cst = arith.constant dense<0.000000e+00> : vector<16x512xf32>
    %4 = tpu.matmul %3, %1, %cst {dimension_numbers = #tpu.dot_dimension_numbers<[1], [0], [0], [1], [0, 0, 1, 1], [], []>} : vector<16x8xf32>, vector<8x512xf32>, vector<16x512xf32> -> vector<16x512xf32>
    %c511_i32 = arith.constant 511 : i32
    %5 = tpu.dynamic_rotate %1 by %c511_i32 dim 1 : vector<8x512xf32>, i32 -> vector<8x512xf32>
    %c1 = arith.constant 1 : index
    %c0_5 = arith.constant 0 : index
    %c0_6 = arith.constant 0 : index
    %6 = vector.load %arg2[%c1, %c0_5, %c0_6] : memref<27x16x8xf32, #tpu.memory_space<vmem>>, vector<1x16x8xf32>
    %7 = vector.shape_cast %6 : vector<1x16x8xf32> to vector<16x8xf32>
    %cst_7 = arith.constant dense<0.000000e+00> : vector<16x512xf32>
    %8 = tpu.matmul %7, %5, %cst_7 {dimension_numbers = #tpu.dot_dimension_numbers<[1], [0], [0], [1], [0, 0, 1, 1], [], []>} : vector<16x8xf32>, vector<8x512xf32>, vector<16x512xf32> -> vector<16x512xf32>
    %9 = arith.addf %4, %8 : vector<16x512xf32>
    %c510_i32 = arith.constant 510 : i32
    %10 = tpu.dynamic_rotate %1 by %c510_i32 dim 1 : vector<8x512xf32>, i32 -> vector<8x512xf32>
    %c2 = arith.constant 2 : index
    %c0_8 = arith.constant 0 : index
    %c0_9 = arith.constant 0 : index
    %11 = vector.load %arg2[%c2, %c0_8, %c0_9] : memref<27x16x8xf32, #tpu.memory_space<vmem>>, vector<1x16x8xf32>
    %12 = vector.shape_cast %11 : vector<1x16x8xf32> to vector<16x8xf32>
    %cst_10 = arith.constant dense<0.000000e+00> : vector<16x512xf32>
    %13 = tpu.matmul %12, %10, %cst_10 {dimension_numbers = #tpu.dot_dimension_numbers<[1], [0], [0], [1], [0, 0, 1, 1], [], []>} : vector<16x8xf32>, vector<8x512xf32>, vector<16x512xf32> -> vector<16x512xf32>
    %14 = arith.addf %9, %13 : vector<16x512xf32>
    %c504_i32 = arith.constant 504 : i32
    %15 = tpu.dynamic_rotate %1 by %c504_i32 dim 1 : vector<8x512xf32>, i32 -> vector<8x512xf32>
    %c3 = arith.constant 3 : index
    %c0_11 = arith.constant 0 : index
    %c0_12 = arith.constant 0 : index
    %16 = vector.load %arg2[%c3, %c0_11, %c0_12] : memref<27x16x8xf32, #tpu.memory_space<vmem>>, vector<1x16x8xf32>
    %17 = vector.shape_cast %16 : vector<1x16x8xf32> to vector<16x8xf32>
    %cst_13 = arith.constant dense<0.000000e+00> : vector<16x512xf32>
    %18 = tpu.matmul %17, %15, %cst_13 {dimension_numbers = #tpu.dot_dimension_numbers<[1], [0], [0], [1], [0, 0, 1, 1], [], []>} : vector<16x8xf32>, vector<8x512xf32>, vector<16x512xf32> -> vector<16x512xf32>
    %19 = arith.addf %14, %18 : vector<16x512xf32>
    %c503_i32 = arith.constant 503 : i32
    %20 = tpu.dynamic_rotate %1 by %c503_i32 dim 1 : vector<8x512xf32>, i32 -> vector<8x512xf32>
    %c4 = arith.constant 4 : index
    %c0_14 = arith.constant 0 : index
    %c0_15 = arith.constant 0 : index
    %21 = vector.load %arg2[%c4, %c0_14, %c0_15] : memref<27x16x8xf32, #tpu.memory_space<vmem>>, vector<1x16x8xf32>
    %22 = vector.shape_cast %21 : vector<1x16x8xf32> to vector<16x8xf32>
    %cst_16 = arith.constant dense<0.000000e+00> : vector<16x512xf32>
    %23 = tpu.matmul %22, %20, %cst_16 {dimension_numbers = #tpu.dot_dimension_numbers<[1], [0], [0], [1], [0, 0, 1, 1], [], []>} : vector<16x8xf32>, vector<8x512xf32>, vector<16x512xf32> -> vector<16x512xf32>
    %24 = arith.addf %19, %23 : vector<16x512xf32>
    %c502_i32 = arith.constant 502 : i32
    %25 = tpu.dynamic_rotate %1 by %c502_i32 dim 1 : vector<8x512xf32>, i32 -> vector<8x512xf32>
    %c5 = arith.constant 5 : index
    %c0_17 = arith.constant 0 : index
    %c0_18 = arith.constant 0 : index
    %26 = vector.load %arg2[%c5, %c0_17, %c0_18] : memref<27x16x8xf32, #tpu.memory_space<vmem>>, vector<1x16x8xf32>
    %27 = vector.shape_cast %26 : vector<1x16x8xf32> to vector<16x8xf32>
    %cst_19 = arith.constant dense<0.000000e+00> : vector<16x512xf32>
    %28 = tpu.matmul %27, %25, %cst_19 {dimension_numbers = #tpu.dot_dimension_numbers<[1], [0], [0], [1], [0, 0, 1, 1], [], []>} : vector<16x8xf32>, vector<8x512xf32>, vector<16x512xf32> -> vector<16x512xf32>
    %29 = arith.addf %24, %28 : vector<16x512xf32>
    %c496_i32 = arith.constant 496 : i32
    %30 = tpu.dynamic_rotate %1 by %c496_i32 dim 1 : vector<8x512xf32>, i32 -> vector<8x512xf32>
    %c6 = arith.constant 6 : index
    %c0_20 = arith.constant 0 : index
    %c0_21 = arith.constant 0 : index
    %31 = vector.load %arg2[%c6, %c0_20, %c0_21] : memref<27x16x8xf32, #tpu.memory_space<vmem>>, vector<1x16x8xf32>
    %32 = vector.shape_cast %31 : vector<1x16x8xf32> to vector<16x8xf32>
    %cst_22 = arith.constant dense<0.000000e+00> : vector<16x512xf32>
    %33 = tpu.matmul %32, %30, %cst_22 {dimension_numbers = #tpu.dot_dimension_numbers<[1], [0], [0], [1], [0, 0, 1, 1], [], []>} : vector<16x8xf32>, vector<8x512xf32>, vector<16x512xf32> -> vector<16x512xf32>
    %34 = arith.addf %29, %33 : vector<16x512xf32>
    %c495_i32 = arith.constant 495 : i32
    %35 = tpu.dynamic_rotate %1 by %c495_i32 dim 1 : vector<8x512xf32>, i32 -> vector<8x512xf32>
    %c7 = arith.constant 7 : index
    %c0_23 = arith.constant 0 : index
    %c0_24 = arith.constant 0 : index
    %36 = vector.load %arg2[%c7, %c0_23, %c0_24] : memref<27x16x8xf32, #tpu.memory_space<vmem>>, vector<1x16x8xf32>
    %37 = vector.shape_cast %36 : vector<1x16x8xf32> to vector<16x8xf32>
    %cst_25 = arith.constant dense<0.000000e+00> : vector<16x512xf32>
    %38 = tpu.matmul %37, %35, %cst_25 {dimension_numbers = #tpu.dot_dimension_numbers<[1], [0], [0], [1], [0, 0, 1, 1], [], []>} : vector<16x8xf32>, vector<8x512xf32>, vector<16x512xf32> -> vector<16x512xf32>
    %39 = arith.addf %34, %38 : vector<16x512xf32>
    %c494_i32 = arith.constant 494 : i32
    %40 = tpu.dynamic_rotate %1 by %c494_i32 dim 1 : vector<8x512xf32>, i32 -> vector<8x512xf32>
    %c8 = arith.constant 8 : index
    %c0_26 = arith.constant 0 : index
    %c0_27 = arith.constant 0 : index
    %41 = vector.load %arg2[%c8, %c0_26, %c0_27] : memref<27x16x8xf32, #tpu.memory_space<vmem>>, vector<1x16x8xf32>
    %42 = vector.shape_cast %41 : vector<1x16x8xf32> to vector<16x8xf32>
    %cst_28 = arith.constant dense<0.000000e+00> : vector<16x512xf32>
    %43 = tpu.matmul %42, %40, %cst_28 {dimension_numbers = #tpu.dot_dimension_numbers<[1], [0], [0], [1], [0, 0, 1, 1], [], []>} : vector<16x8xf32>, vector<8x512xf32>, vector<16x512xf32> -> vector<16x512xf32>
    %44 = arith.addf %39, %43 : vector<16x512xf32>
    %c448_i32 = arith.constant 448 : i32
    %45 = tpu.dynamic_rotate %1 by %c448_i32 dim 1 : vector<8x512xf32>, i32 -> vector<8x512xf32>
    %c9 = arith.constant 9 : index
    %c0_29 = arith.constant 0 : index
    %c0_30 = arith.constant 0 : index
    %46 = vector.load %arg2[%c9, %c0_29, %c0_30] : memref<27x16x8xf32, #tpu.memory_space<vmem>>, vector<1x16x8xf32>
    %47 = vector.shape_cast %46 : vector<1x16x8xf32> to vector<16x8xf32>
    %cst_31 = arith.constant dense<0.000000e+00> : vector<16x512xf32>
    %48 = tpu.matmul %47, %45, %cst_31 {dimension_numbers = #tpu.dot_dimension_numbers<[1], [0], [0], [1], [0, 0, 1, 1], [], []>} : vector<16x8xf32>, vector<8x512xf32>, vector<16x512xf32> -> vector<16x512xf32>
    %49 = arith.addf %44, %48 : vector<16x512xf32>
    %c447_i32 = arith.constant 447 : i32
    %50 = tpu.dynamic_rotate %1 by %c447_i32 dim 1 : vector<8x512xf32>, i32 -> vector<8x512xf32>
    %c10 = arith.constant 10 : index
    %c0_32 = arith.constant 0 : index
    %c0_33 = arith.constant 0 : index
    %51 = vector.load %arg2[%c10, %c0_32, %c0_33] : memref<27x16x8xf32, #tpu.memory_space<vmem>>, vector<1x16x8xf32>
    %52 = vector.shape_cast %51 : vector<1x16x8xf32> to vector<16x8xf32>
    %cst_34 = arith.constant dense<0.000000e+00> : vector<16x512xf32>
    %53 = tpu.matmul %52, %50, %cst_34 {dimension_numbers = #tpu.dot_dimension_numbers<[1], [0], [0], [1], [0, 0, 1, 1], [], []>} : vector<16x8xf32>, vector<8x512xf32>, vector<16x512xf32> -> vector<16x512xf32>
    %54 = arith.addf %49, %53 : vector<16x512xf32>
    %c446_i32 = arith.constant 446 : i32
    %55 = tpu.dynamic_rotate %1 by %c446_i32 dim 1 : vector<8x512xf32>, i32 -> vector<8x512xf32>
    %c11 = arith.constant 11 : index
    %c0_35 = arith.constant 0 : index
    %c0_36 = arith.constant 0 : index
    %56 = vector.load %arg2[%c11, %c0_35, %c0_36] : memref<27x16x8xf32, #tpu.memory_space<vmem>>, vector<1x16x8xf32>
    %57 = vector.shape_cast %56 : vector<1x16x8xf32> to vector<16x8xf32>
    %cst_37 = arith.constant dense<0.000000e+00> : vector<16x512xf32>
    %58 = tpu.matmul %57, %55, %cst_37 {dimension_numbers = #tpu.dot_dimension_numbers<[1], [0], [0], [1], [0, 0, 1, 1], [], []>} : vector<16x8xf32>, vector<8x512xf32>, vector<16x512xf32> -> vector<16x512xf32>
    %59 = arith.addf %54, %58 : vector<16x512xf32>
    %c440_i32 = arith.constant 440 : i32
    %60 = tpu.dynamic_rotate %1 by %c440_i32 dim 1 : vector<8x512xf32>, i32 -> vector<8x512xf32>
    %c12 = arith.constant 12 : index
    %c0_38 = arith.constant 0 : index
    %c0_39 = arith.constant 0 : index
    %61 = vector.load %arg2[%c12, %c0_38, %c0_39] : memref<27x16x8xf32, #tpu.memory_space<vmem>>, vector<1x16x8xf32>
    %62 = vector.shape_cast %61 : vector<1x16x8xf32> to vector<16x8xf32>
    %cst_40 = arith.constant dense<0.000000e+00> : vector<16x512xf32>
    %63 = tpu.matmul %62, %60, %cst_40 {dimension_numbers = #tpu.dot_dimension_numbers<[1], [0], [0], [1], [0, 0, 1, 1], [], []>} : vector<16x8xf32>, vector<8x512xf32>, vector<16x512xf32> -> vector<16x512xf32>
    %64 = arith.addf %59, %63 : vector<16x512xf32>
    %c439_i32 = arith.constant 439 : i32
    %65 = tpu.dynamic_rotate %1 by %c439_i32 dim 1 : vector<8x512xf32>, i32 -> vector<8x512xf32>
    %c13 = arith.constant 13 : index
    %c0_41 = arith.constant 0 : index
    %c0_42 = arith.constant 0 : index
    %66 = vector.load %arg2[%c13, %c0_41, %c0_42] : memref<27x16x8xf32, #tpu.memory_space<vmem>>, vector<1x16x8xf32>
    %67 = vector.shape_cast %66 : vector<1x16x8xf32> to vector<16x8xf32>
    %cst_43 = arith.constant dense<0.000000e+00> : vector<16x512xf32>
    %68 = tpu.matmul %67, %65, %cst_43 {dimension_numbers = #tpu.dot_dimension_numbers<[1], [0], [0], [1], [0, 0, 1, 1], [], []>} : vector<16x8xf32>, vector<8x512xf32>, vector<16x512xf32> -> vector<16x512xf32>
    %69 = arith.addf %64, %68 : vector<16x512xf32>
    %c438_i32 = arith.constant 438 : i32
    %70 = tpu.dynamic_rotate %1 by %c438_i32 dim 1 : vector<8x512xf32>, i32 -> vector<8x512xf32>
    %c14 = arith.constant 14 : index
    %c0_44 = arith.constant 0 : index
    %c0_45 = arith.constant 0 : index
    %71 = vector.load %arg2[%c14, %c0_44, %c0_45] : memref<27x16x8xf32, #tpu.memory_space<vmem>>, vector<1x16x8xf32>
    %72 = vector.shape_cast %71 : vector<1x16x8xf32> to vector<16x8xf32>
    %cst_46 = arith.constant dense<0.000000e+00> : vector<16x512xf32>
    %73 = tpu.matmul %72, %70, %cst_46 {dimension_numbers = #tpu.dot_dimension_numbers<[1], [0], [0], [1], [0, 0, 1, 1], [], []>} : vector<16x8xf32>, vector<8x512xf32>, vector<16x512xf32> -> vector<16x512xf32>
    %74 = arith.addf %69, %73 : vector<16x512xf32>
    %c432_i32 = arith.constant 432 : i32
    %75 = tpu.dynamic_rotate %1 by %c432_i32 dim 1 : vector<8x512xf32>, i32 -> vector<8x512xf32>
    %c15 = arith.constant 15 : index
    %c0_47 = arith.constant 0 : index
    %c0_48 = arith.constant 0 : index
    %76 = vector.load %arg2[%c15, %c0_47, %c0_48] : memref<27x16x8xf32, #tpu.memory_space<vmem>>, vector<1x16x8xf32>
    %77 = vector.shape_cast %76 : vector<1x16x8xf32> to vector<16x8xf32>
    %cst_49 = arith.constant dense<0.000000e+00> : vector<16x512xf32>
    %78 = tpu.matmul %77, %75, %cst_49 {dimension_numbers = #tpu.dot_dimension_numbers<[1], [0], [0], [1], [0, 0, 1, 1], [], []>} : vector<16x8xf32>, vector<8x512xf32>, vector<16x512xf32> -> vector<16x512xf32>
    %79 = arith.addf %74, %78 : vector<16x512xf32>
    %c431_i32 = arith.constant 431 : i32
    %80 = tpu.dynamic_rotate %1 by %c431_i32 dim 1 : vector<8x512xf32>, i32 -> vector<8x512xf32>
    %c16 = arith.constant 16 : index
    %c0_50 = arith.constant 0 : index
    %c0_51 = arith.constant 0 : index
    %81 = vector.load %arg2[%c16, %c0_50, %c0_51] : memref<27x16x8xf32, #tpu.memory_space<vmem>>, vector<1x16x8xf32>
    %82 = vector.shape_cast %81 : vector<1x16x8xf32> to vector<16x8xf32>
    %cst_52 = arith.constant dense<0.000000e+00> : vector<16x512xf32>
    %83 = tpu.matmul %82, %80, %cst_52 {dimension_numbers = #tpu.dot_dimension_numbers<[1], [0], [0], [1], [0, 0, 1, 1], [], []>} : vector<16x8xf32>, vector<8x512xf32>, vector<16x512xf32> -> vector<16x512xf32>
    %84 = arith.addf %79, %83 : vector<16x512xf32>
    %c430_i32 = arith.constant 430 : i32
    %85 = tpu.dynamic_rotate %1 by %c430_i32 dim 1 : vector<8x512xf32>, i32 -> vector<8x512xf32>
    %c17 = arith.constant 17 : index
    %c0_53 = arith.constant 0 : index
    %c0_54 = arith.constant 0 : index
    %86 = vector.load %arg2[%c17, %c0_53, %c0_54] : memref<27x16x8xf32, #tpu.memory_space<vmem>>, vector<1x16x8xf32>
    %87 = vector.shape_cast %86 : vector<1x16x8xf32> to vector<16x8xf32>
    %cst_55 = arith.constant dense<0.000000e+00> : vector<16x512xf32>
    %88 = tpu.matmul %87, %85, %cst_55 {dimension_numbers = #tpu.dot_dimension_numbers<[1], [0], [0], [1], [0, 0, 1, 1], [], []>} : vector<16x8xf32>, vector<8x512xf32>, vector<16x512xf32> -> vector<16x512xf32>
    %89 = arith.addf %84, %88 : vector<16x512xf32>
    %c384_i32 = arith.constant 384 : i32
    %90 = tpu.dynamic_rotate %1 by %c384_i32 dim 1 : vector<8x512xf32>, i32 -> vector<8x512xf32>
    %c18 = arith.constant 18 : index
    %c0_56 = arith.constant 0 : index
    %c0_57 = arith.constant 0 : index
    %91 = vector.load %arg2[%c18, %c0_56, %c0_57] : memref<27x16x8xf32, #tpu.memory_space<vmem>>, vector<1x16x8xf32>
    %92 = vector.shape_cast %91 : vector<1x16x8xf32> to vector<16x8xf32>
    %cst_58 = arith.constant dense<0.000000e+00> : vector<16x512xf32>
    %93 = tpu.matmul %92, %90, %cst_58 {dimension_numbers = #tpu.dot_dimension_numbers<[1], [0], [0], [1], [0, 0, 1, 1], [], []>} : vector<16x8xf32>, vector<8x512xf32>, vector<16x512xf32> -> vector<16x512xf32>
    %94 = arith.addf %89, %93 : vector<16x512xf32>
    %c383_i32 = arith.constant 383 : i32
    %95 = tpu.dynamic_rotate %1 by %c383_i32 dim 1 : vector<8x512xf32>, i32 -> vector<8x512xf32>
    %c19 = arith.constant 19 : index
    %c0_59 = arith.constant 0 : index
    %c0_60 = arith.constant 0 : index
    %96 = vector.load %arg2[%c19, %c0_59, %c0_60] : memref<27x16x8xf32, #tpu.memory_space<vmem>>, vector<1x16x8xf32>
    %97 = vector.shape_cast %96 : vector<1x16x8xf32> to vector<16x8xf32>
    %cst_61 = arith.constant dense<0.000000e+00> : vector<16x512xf32>
    %98 = tpu.matmul %97, %95, %cst_61 {dimension_numbers = #tpu.dot_dimension_numbers<[1], [0], [0], [1], [0, 0, 1, 1], [], []>} : vector<16x8xf32>, vector<8x512xf32>, vector<16x512xf32> -> vector<16x512xf32>
    %99 = arith.addf %94, %98 : vector<16x512xf32>
    %c382_i32 = arith.constant 382 : i32
    %100 = tpu.dynamic_rotate %1 by %c382_i32 dim 1 : vector<8x512xf32>, i32 -> vector<8x512xf32>
    %c20 = arith.constant 20 : index
    %c0_62 = arith.constant 0 : index
    %c0_63 = arith.constant 0 : index
    %101 = vector.load %arg2[%c20, %c0_62, %c0_63] : memref<27x16x8xf32, #tpu.memory_space<vmem>>, vector<1x16x8xf32>
    %102 = vector.shape_cast %101 : vector<1x16x8xf32> to vector<16x8xf32>
    %cst_64 = arith.constant dense<0.000000e+00> : vector<16x512xf32>
    %103 = tpu.matmul %102, %100, %cst_64 {dimension_numbers = #tpu.dot_dimension_numbers<[1], [0], [0], [1], [0, 0, 1, 1], [], []>} : vector<16x8xf32>, vector<8x512xf32>, vector<16x512xf32> -> vector<16x512xf32>
    %104 = arith.addf %99, %103 : vector<16x512xf32>
    %c376_i32 = arith.constant 376 : i32
    %105 = tpu.dynamic_rotate %1 by %c376_i32 dim 1 : vector<8x512xf32>, i32 -> vector<8x512xf32>
    %c21 = arith.constant 21 : index
    %c0_65 = arith.constant 0 : index
    %c0_66 = arith.constant 0 : index
    %106 = vector.load %arg2[%c21, %c0_65, %c0_66] : memref<27x16x8xf32, #tpu.memory_space<vmem>>, vector<1x16x8xf32>
    %107 = vector.shape_cast %106 : vector<1x16x8xf32> to vector<16x8xf32>
    %cst_67 = arith.constant dense<0.000000e+00> : vector<16x512xf32>
    %108 = tpu.matmul %107, %105, %cst_67 {dimension_numbers = #tpu.dot_dimension_numbers<[1], [0], [0], [1], [0, 0, 1, 1], [], []>} : vector<16x8xf32>, vector<8x512xf32>, vector<16x512xf32> -> vector<16x512xf32>
    %109 = arith.addf %104, %108 : vector<16x512xf32>
    %c375_i32 = arith.constant 375 : i32
    %110 = tpu.dynamic_rotate %1 by %c375_i32 dim 1 : vector<8x512xf32>, i32 -> vector<8x512xf32>
    %c22 = arith.constant 22 : index
    %c0_68 = arith.constant 0 : index
    %c0_69 = arith.constant 0 : index
    %111 = vector.load %arg2[%c22, %c0_68, %c0_69] : memref<27x16x8xf32, #tpu.memory_space<vmem>>, vector<1x16x8xf32>
    %112 = vector.shape_cast %111 : vector<1x16x8xf32> to vector<16x8xf32>
    %cst_70 = arith.constant dense<0.000000e+00> : vector<16x512xf32>
    %113 = tpu.matmul %112, %110, %cst_70 {dimension_numbers = #tpu.dot_dimension_numbers<[1], [0], [0], [1], [0, 0, 1, 1], [], []>} : vector<16x8xf32>, vector<8x512xf32>, vector<16x512xf32> -> vector<16x512xf32>
    %114 = arith.addf %109, %113 : vector<16x512xf32>
    %c374_i32 = arith.constant 374 : i32
    %115 = tpu.dynamic_rotate %1 by %c374_i32 dim 1 : vector<8x512xf32>, i32 -> vector<8x512xf32>
    %c23 = arith.constant 23 : index
    %c0_71 = arith.constant 0 : index
    %c0_72 = arith.constant 0 : index
    %116 = vector.load %arg2[%c23, %c0_71, %c0_72] : memref<27x16x8xf32, #tpu.memory_space<vmem>>, vector<1x16x8xf32>
    %117 = vector.shape_cast %116 : vector<1x16x8xf32> to vector<16x8xf32>
    %cst_73 = arith.constant dense<0.000000e+00> : vector<16x512xf32>
    %118 = tpu.matmul %117, %115, %cst_73 {dimension_numbers = #tpu.dot_dimension_numbers<[1], [0], [0], [1], [0, 0, 1, 1], [], []>} : vector<16x8xf32>, vector<8x512xf32>, vector<16x512xf32> -> vector<16x512xf32>
    %119 = arith.addf %114, %118 : vector<16x512xf32>
    %c368_i32 = arith.constant 368 : i32
    %120 = tpu.dynamic_rotate %1 by %c368_i32 dim 1 : vector<8x512xf32>, i32 -> vector<8x512xf32>
    %c24 = arith.constant 24 : index
    %c0_74 = arith.constant 0 : index
    %c0_75 = arith.constant 0 : index
    %121 = vector.load %arg2[%c24, %c0_74, %c0_75] : memref<27x16x8xf32, #tpu.memory_space<vmem>>, vector<1x16x8xf32>
    %122 = vector.shape_cast %121 : vector<1x16x8xf32> to vector<16x8xf32>
    %cst_76 = arith.constant dense<0.000000e+00> : vector<16x512xf32>
    %123 = tpu.matmul %122, %120, %cst_76 {dimension_numbers = #tpu.dot_dimension_numbers<[1], [0], [0], [1], [0, 0, 1, 1], [], []>} : vector<16x8xf32>, vector<8x512xf32>, vector<16x512xf32> -> vector<16x512xf32>
    %124 = arith.addf %119, %123 : vector<16x512xf32>
    %c367_i32 = arith.constant 367 : i32
    %125 = tpu.dynamic_rotate %1 by %c367_i32 dim 1 : vector<8x512xf32>, i32 -> vector<8x512xf32>
    %c25 = arith.constant 25 : index
    %c0_77 = arith.constant 0 : index
    %c0_78 = arith.constant 0 : index
    %126 = vector.load %arg2[%c25, %c0_77, %c0_78] : memref<27x16x8xf32, #tpu.memory_space<vmem>>, vector<1x16x8xf32>
    %127 = vector.shape_cast %126 : vector<1x16x8xf32> to vector<16x8xf32>
    %cst_79 = arith.constant dense<0.000000e+00> : vector<16x512xf32>
    %128 = tpu.matmul %127, %125, %cst_79 {dimension_numbers = #tpu.dot_dimension_numbers<[1], [0], [0], [1], [0, 0, 1, 1], [], []>} : vector<16x8xf32>, vector<8x512xf32>, vector<16x512xf32> -> vector<16x512xf32>
    %129 = arith.addf %124, %128 : vector<16x512xf32>
    %c366_i32 = arith.constant 366 : i32
    %130 = tpu.dynamic_rotate %1 by %c366_i32 dim 1 : vector<8x512xf32>, i32 -> vector<8x512xf32>
    %c26 = arith.constant 26 : index
    %c0_80 = arith.constant 0 : index
    %c0_81 = arith.constant 0 : index
    %131 = vector.load %arg2[%c26, %c0_80, %c0_81] : memref<27x16x8xf32, #tpu.memory_space<vmem>>, vector<1x16x8xf32>
    %132 = vector.shape_cast %131 : vector<1x16x8xf32> to vector<16x8xf32>
    %cst_82 = arith.constant dense<0.000000e+00> : vector<16x512xf32>
    %133 = tpu.matmul %132, %130, %cst_82 {dimension_numbers = #tpu.dot_dimension_numbers<[1], [0], [0], [1], [0, 0, 1, 1], [], []>} : vector<16x8xf32>, vector<8x512xf32>, vector<16x512xf32> -> vector<16x512xf32>
    %134 = arith.addf %129, %133 : vector<16x512xf32>
    %c0_83 = arith.constant 0 : index
    %c0_84 = arith.constant 0 : index
    %135 = vector.load %arg3[%c0_83, %c0_84] : memref<16x1xf32, #tpu.memory_space<vmem>>, vector<16x1xf32>
    %136 = vector.broadcast %135 : vector<16x1xf32> to vector<16x512xf32>
    %137 = arith.addf %134, %136 : vector<16x512xf32>
    %cst_85 = arith.constant 3.000000e+00 : f32
    %138 = vector.broadcast %cst_85 : f32 to vector<16x512xf32>
    %139 = arith.addf %137, %138 : vector<16x512xf32>
    %cst_86 = arith.constant 0.000000e+00 : f32
    %cst_87 = arith.constant 6.000000e+00 : f32
    %140 = vector.broadcast %cst_86 : f32 to vector<16x512xf32>
    %141 = arith.maximumf %140, %139 : vector<16x512xf32>
    %142 = vector.broadcast %cst_87 : f32 to vector<16x512xf32>
    %143 = arith.minimumf %142, %141 : vector<16x512xf32>
    %144 = arith.mulf %137, %143 : vector<16x512xf32>
    %cst_88 = arith.constant 0.166666672 : f32
    %145 = vector.broadcast %cst_88 : f32 to vector<16x512xf32>
    %146 = arith.mulf %144, %145 : vector<16x512xf32>
    %cst_89 = arith.constant 0.000000e+00 : f32
    %147 = vector.broadcast %cst_89 : f32 to vector<16x512xf32>
    %148 = arith.maximumf %146, %147 : vector<16x512xf32>
    %cst_90 = arith.constant dense<0xFF800000> : vector<512xf32>
    %149 = vector.multi_reduction <maximumf>, %148, %cst_90 [0] : vector<16x512xf32> to vector<512xf32>
    %150 = vector.shape_cast %149 : vector<512xf32> to vector<1x512xf32>
    %151 = vector.broadcast %150 : vector<1x512xf32> to vector<16x512xf32>
    %152 = arith.subf %148, %151 : vector<16x512xf32>
    %153 = math.exp %152 : vector<16x512xf32>
    %cst_91 = arith.constant dense<0.000000e+00> : vector<512xf32>
    %154 = vector.multi_reduction <add>, %153, %cst_91 [0] : vector<16x512xf32> to vector<512xf32>
    %155 = vector.shape_cast %154 : vector<512xf32> to vector<1x512xf32>
    %c0_92 = arith.constant 0 : index
    %c0_93 = arith.constant 0 : index
    %156 = vector.load %arg4[%c0_92, %c0_93] : memref<1x512xf32, #tpu.memory_space<vmem>>, vector<1x512xf32>
    %157 = tpu.reciprocal %155 : vector<1x512xf32> -> vector<1x512xf32>
    %158 = arith.mulf %156, %157 : vector<1x512xf32>
    %cst_94 = arith.constant dense<0.000000e+00> : vector<1x16xf32>
    %159 = tpu.matmul %158, %153, %cst_94 {dimension_numbers = #tpu.dot_dimension_numbers<[1], [1], [0], [0], [0, 0, 1, 0], [], []>} : vector<1x512xf32>, vector<16x512xf32>, vector<1x16xf32> -> vector<1x16xf32>
    %c0_95 = arith.constant 0 : index
    %c0_96 = arith.constant 0 : index
    %c0_97 = arith.constant 0 : index
    %160 = vector.load %arg5[%c0_95, %c0_96, %c0_97] : memref<1x1x16xf32, #tpu.memory_space<vmem>>, vector<1x1x16xf32>
    %161 = vector.shape_cast %160 : vector<1x1x16xf32> to vector<1x16xf32>
    %162 = vector.shape_cast %159 : vector<1x16xf32> to vector<1x1x16xf32>
    tpu.vector_store %arg5[%c0_95, %c0_96, %c0_97], %162 {strides = array<i32>} : memref<1x1x16xf32, #tpu.memory_space<vmem>>, vector<1x1x16xf32>,
    return
  }
  func.func @transform_0(%arg0: i32) -> (i32, i32, i32) {
    %c0_i32 = arith.constant 0 : i32
    %c0_i32_0 = arith.constant 0 : i32
    %c0_i32_1 = arith.constant 0 : i32
    return %arg0, %c0_i32, %c0_i32_0 : i32, i32, i32
  }
  func.func @transform_1(%arg0: i32) -> (i32, i32, i32) {
    %c0_i32 = arith.constant 0 : i32
    %c0_i32_0 = arith.constant 0 : i32
    %c0_i32_1 = arith.constant 0 : i32
    %c0_i32_2 = arith.constant 0 : i32
    return %c0_i32, %c0_i32_0, %c0_i32_1 : i32, i32, i32
  }
  func.func @transform_2(%arg0: i32) -> (i32, i32) {
    %c0_i32 = arith.constant 0 : i32
    %c0_i32_0 = arith.constant 0 : i32
    %c0_i32_1 = arith.constant 0 : i32
    return %c0_i32, %c0_i32_0 : i32, i32
  }
  func.func @transform_3(%arg0: i32) -> (i32, i32) {
    %c0_i32 = arith.constant 0 : i32
    %c0_i32_0 = arith.constant 0 : i32
    %c0_i32_1 = arith.constant 0 : i32
    return %c0_i32, %c0_i32_0 : i32, i32
  }
  func.func @transform_4(%arg0: i32) -> (i32, i32, i32) {
    %c0_i32 = arith.constant 0 : i32
    %c0_i32_0 = arith.constant 0 : i32
    %c0_i32_1 = arith.constant 0 : i32
    return %arg0, %c0_i32, %c0_i32_0 : i32, i32, i32
  }
}

</mosaic_0001>

<bundles_post_ra>
// kernel: model_forward.1
= control target key start
LH: loop header
LB: loop body
LE: loop exit
PB: predicated region body
PF: predicated region fallthrough
CT: control target
= control target key end

     0   :  { %9 = vsyncpa [#allocation3], 0  ;;  %s6851_s0 = inlined_call_operand.vmem [shape: f32[2,8,512], index: 0, kind: input, shape index: {}]   ;;  %s6852_s1 = inlined_call_operand.vmem [shape: f32[27,16,8], index: 1, kind: input, shape index: {}]   ;;  %s6853_s2 = inlined_call_operand.vmem [shape: f32[16,1], index: 2, kind: input, shape index: {}]   ;;  %s6854_s3 = inlined_call_operand.vmem [shape: f32[1,512], index: 3, kind: input, shape index: {}]   ;;  %s6855_s4 = inlined_call_operand.hbm [shape: f32[2,1,16], index: 4, kind: output, shape index: {}]  }
   0x1   :  { %11 = vsyncpa [#allocation3 + $0x1], 0  ;;  %s6019_s15 = smov 0   ;;  %s6021_s16 = smov 0  }
   0x2   :  { %s6023_s17 = smov 0   ;;  %s6025_s18 = smov 0  }
   0x3 LB: > { %s6040_s19 = sadd.s32 4294967295, %s5971_s18   ;;  %s5437_s20 = sadd.s32 4294967294, %s5971_s18   ;;  %s5971_s18 = sphi %s6025_s18, %s6861_s18   ;;  %s5967_s17 = sphi %s6023_s17, %s6860_s17   ;;  %s5963_s16 = sphi %s6021_s16, %s6859_s16   ;;  %s5959_s15 = sphi %s6019_s15, %s6858_s15  }
   0x4   : > { %s6044_s21 = sadd.s32 1, %s5971_s18   ;;  %s113_s22 = sadd.s32 1, %s5967_s17 }
   0x5   : > { %s110_s23 = ssub.s32 %s5971_s18, %s6044_s21  ;;  %p123_p0 = scmp.ne.s32.totalorder %s5967_s17, %s5963_s16 }
   0x6   : > { %p111_p1 = scmp.eq.s32.totalorder %s110_s23, 0  ;;  %p124_p2 = scmp.eq.s32.totalorder %s6040_s19, 1 }
   0x7   : > { %p129_p3 = scmp.ne.s32.totalorder %s5963_s16, %s5959_s15  ;;  %p130_p4 = scmp.eq.s32.totalorder %s5437_s20, 1 }
   0x8   : > { %s6055_s24 = scalar_select %p111_p1, %s5967_s17, %s113_s22  }
   0x9   : > { %p6057_p5 = por %p124_p2, %p123_p0  ;;  %p6061_p6 = por %p130_p4, %p129_p3 }
   0xa   : > { %p5440_p7 = scmp.ge.s32.totalorder %s5971_s18, 1  ;;  %p165_p8 = scmp.lt.s32.totalorder %s5971_s18, 3 }
   0xc   : > { %p166_p9 = pnand %p5440_p7, %p165_p8 }
   0xd   : > { %p190_p10 = scmp.lt.s32.totalorder (!%p166_p9), %s6040_s19, 1  ;;  %v5973_v0 = vmov (!%p166_p9), 0.0   ;;  %s5974_s6 = smov (!%p166_p9), 127   ;;  %v209_v5 = vlaneseq (!%p166_p9)  ;;  %v5443_v15 = vld [vmem:[%s6852_s1 + $0x10] sm:$0xff] (!%p166_p9)  ;;  %vm219_vm1 = vcmask (!%p166_p9), 64512   ;;  %v5444_v18 = vld [vmem:[%s6852_s1 + $0x18] sm:$0xff] (!%p166_p9) }
   0xe   : > { %169 = sbr.rel (%p166_p9) target bundleno = 890 (0x37a), region = 36  ;;  %290 = vmatprep.mubr.f32.mxu0 (!%p166_p9), %v5973_v0  ;;  %367 = vmatprep.mubr.f32.mxu1 (!%p166_p9), %v5973_v0  ;;  %s5975_s7 = smov (!%p166_p9), 126   ;;  %v199_v23 = vld [vmem:[%s6852_s1] sm:$0xff] (!%p166_p9)  ;;  %v200_v28 = vld [vmem:[%s6852_s1 + $0x8] sm:$0xff] (!%p166_p9)  ;;  %v5459_v43 = vld [vmem:[%s6852_s1 + $0x30] sm:$0xff] (!%p166_p9) }
   0xf   : > { %s5976_s8 = smov (!%p166_p9), 120   ;;  %s5977_s9 = smov (!%p166_p9), 119   ;;  %v6141_v6 = vand.u32 (!%p166_p9), 127, %v209_v5  ;;  %v5453_v33 = vld [vmem:[%s6852_s1 + $0x20] sm:$0xff] (!%p166_p9)  ;;  %v5454_v38 = vld [vmem:[%s6852_s1 + $0x28] sm:$0xff] (!%p166_p9)  ;;  %v5460_v48 = vld [vmem:[%s6852_s1 + $0x38] sm:$0xff] (!%p166_p9) }
  0x10   : > { %s5978_s10 = smov (!%p166_p9), 118   ;;  %s5979_s11 = smov (!%p166_p9), 112   ;;  %v5465_v53 = vld [vmem:[%s6852_s1 + $0x40] sm:$0xff] (!%p166_p9)  ;;  %v5466_v58 = vld [vmem:[%s6852_s1 + $0x48] sm:$0xff] (!%p166_p9)  ;;  %v5471_v63 = vld [vmem:[%s6852_s1 + $0x50] sm:$0xff] (!%p166_p9) }
  0x11   : > { %s5980_s12 = smov (!%p166_p9), 111   ;;  %s5981_s13 = smov (!%p166_p9), 110   ;;  %vm211_vm0 = vcmp.lt.s32.totalorder (!%p166_p9), %v6141_v6, 127  ;;  %vm548_vm2 = vcmp.lt.s32.totalorder (!%p166_p9), %v6141_v6, 126  ;;  %vm732_vm3 = vcmp.lt.s32.totalorder (!%p166_p9), %v6141_v6, 120  ;;  %vm916_vm4 = vcmp.lt.s32.totalorder (!%p166_p9), %v6141_v6, 119 }
  0x12   : > { %s5982_s14 = smov (!%p166_p9), 64   ;;  %s5983_s20 = smov (!%p166_p9), 63   ;;  %vm1100_vm5 = vcmp.lt.s32.totalorder (!%p166_p9), %v6141_v6, 118  ;;  %vm1284_vm6 = vcmp.lt.s32.totalorder (!%p166_p9), %v6141_v6, 112  ;;  %vm1468_vm7 = vcmp.lt.s32.totalorder (!%p166_p9), %v6141_v6, 111  ;;  %vm1652_vm8 = vcmp.lt.s32.totalorder (!%p166_p9), %v6141_v6, 110 }
  0x13   : > { %s5984_s22 = smov (!%p166_p9), 62   ;;  %s5985_s23 = smov (!%p166_p9), 56   ;;  %vm1836_vm9 = vcmp.lt.s32.totalorder (!%p166_p9), %v6141_v6, 64  ;;  %vm2020_vm10 = vcmp.lt.s32.totalorder (!%p166_p9), %v6141_v6, 63  ;;  %vm2204_vm11 = vcmp.lt.s32.totalorder (!%p166_p9), %v6141_v6, 62  ;;  %vm2388_vm12 = vcmp.lt.s32.totalorder (!%p166_p9), %v6141_v6, 56 }
  0x14   : > { %s5988_s29 = smov (!%p166_p9), 48   ;;  %s5989_s30 = smov (!%p166_p9), 47   ;;  %vm2572_vm13 = vcmp.lt.s32.totalorder (!%p166_p9), %v6141_v6, 55  ;;  %vm2756_vm14 = vcmp.lt.s32.totalorder (!%p166_p9), %v6141_v6, 54  ;;  %vm2940_vm15 = vcmp.lt.s32.totalorder (!%p166_p9), %v6141_v6, 48 }
  0x15   : > { %s191_s27 = scalar_select %p190_p10, %s6040_s19, 1 }
  0x17   : > { %s5606_s28 = sshll.u32 %s191_s27, 5  ;;  %s5986_s27 = smov 55  }
  0x18   : > { %s194_s5 = scalar_lea.vmem %s6851_s0, %s5606_s28  ;;  %s5987_s28 = smov 54  }
  0x19   : > { %v6074_v1 = vld [vmem:[%s194_s5 + $0x10] sm:$0xff]  ;;  %v6076_v2 = vld [vmem:[%s194_s5] sm:$0xff]  ;;  %v6080_v3 = vld [vmem:[%s194_s5 + $0x18] sm:$0xff] }
  0x1a   : > { %205 = vrot.lane.b32.xlu1 %v6074_v1, %s5974_s6  ;;  %201 = vrot.lane.b32.xlu0 %v6076_v2, %s5974_s6  ;;  %v6082_v4 = vld [vmem:[%s194_s5 + $0x8] sm:$0xff] }
  0x1e   : > { %207 = vrot.lane.b32.xlu1 %v6080_v3, %s5974_s6  ;;  %203 = vrot.lane.b32.xlu0 %v6082_v4, %s5974_s6 }
  0x22   : > { %542 = vrot.lane.b32.xlu1 %v6082_v4, %s5975_s7  ;;  %540 = vrot.lane.b32.xlu0 %v6076_v2, %s5975_s7 }
  0x26   : > { %546 = vrot.lane.b32.xlu1 %v6080_v3, %s5975_s7  ;;  %544 = vrot.lane.b32.xlu0 %v6074_v1, %s5975_s7 }
  0x2a   : > { %726 = vrot.lane.b32.xlu1 %v6082_v4, %s5976_s8  ;;  %724 = vrot.lane.b32.xlu0 %v6076_v2, %s5976_s8 }
  0x2e   : > { %730 = vrot.lane.b32.xlu1 %v6080_v3, %s5976_s8  ;;  %728 = vrot.lane.b32.xlu0 %v6074_v1, %s5976_s8 }
  0x32   : > { %910 = vrot.lane.b32.xlu1 %v6082_v4, %s5977_s9  ;;  %908 = vrot.lane.b32.xlu0 %v6076_v2, %s5977_s9 }
  0x36   : > { %914 = vrot.lane.b32.xlu1 %v6080_v3, %s5977_s9  ;;  %912 = vrot.lane.b32.xlu0 %v6074_v1, %s5977_s9  ;;  %s5993_s9 = smov [#allocation2]  }
  0x3a   : > { %1094 = vrot.lane.b32.xlu1 %v6082_v4, %s5978_s10  ;;  %1092 = vrot.lane.b32.xlu0 %v6076_v2, %s5978_s10 }
  0x3e   : > { %1098 = vrot.lane.b32.xlu1 %v6080_v3, %s5978_s10  ;;  %1096 = vrot.lane.b32.xlu0 %v6074_v1, %s5978_s10  ;;  %s5913_s10 = sshll.u32 %s5993_s9, 4  ;;  %s5914_s10 = int_to_ptr.vmem [resolvable:$false] %s5913_s10 }
  0x42   : > { %1278 = vrot.lane.b32.xlu1 %v6082_v4, %s5979_s11  ;;  %1276 = vrot.lane.b32.xlu0 %v6076_v2, %s5979_s11 }
  0x46   : > { %1282 = vrot.lane.b32.xlu1 %v6080_v3, %s5979_s11  ;;  %1280 = vrot.lane.b32.xlu0 %v6074_v1, %s5979_s11  ;;  %s5990_s11 = smov 46  }
  0x4a   : > { %1462 = vrot.lane.b32.xlu1 %v6082_v4, %s5980_s12  ;;  %1460 = vrot.lane.b32.xlu0 %v6076_v2, %s5980_s12 }
  0x4e   : > { %1466 = vrot.lane.b32.xlu1 %v6080_v3, %s5980_s12  ;;  %1464 = vrot.lane.b32.xlu0 %v6074_v1, %s5980_s12 }
  0x52   : > { %1646 = vrot.lane.b32.xlu1 %v6082_v4, %s5981_s13  ;;  %1644 = vrot.lane.b32.xlu0 %v6076_v2, %s5981_s13 }
  0x56   : > { %1650 = vrot.lane.b32.xlu1 %v6080_v3, %s5981_s13  ;;  %1648 = vrot.lane.b32.xlu0 %v6074_v1, %s5981_s13 }
  0x5a   : > { %1830 = vrot.lane.b32.xlu1 %v6082_v4, %s5982_s14  ;;  %1828 = vrot.lane.b32.xlu0 %v6076_v2, %s5982_s14 }
  0x5e   : > { %1834 = vrot.lane.b32.xlu1 %v6080_v3, %s5982_s14  ;;  %1832 = vrot.lane.b32.xlu0 %v6074_v1, %s5982_s14 }
  0x62   : > { %2014 = vrot.lane.b32.xlu1 %v6082_v4, %s5983_s20  ;;  %2012 = vrot.lane.b32.xlu0 %v6076_v2, %s5983_s20 }
  0x66   : > { %2018 = vrot.lane.b32.xlu1 %v6080_v3, %s5983_s20  ;;  %2016 = vrot.lane.b32.xlu0 %v6074_v1, %s5983_s20 }
  0x6a   : > { %2198 = vrot.lane.b32.xlu1 %v6082_v4, %s5984_s22  ;;  %2196 = vrot.lane.b32.xlu0 %v6076_v2, %s5984_s22 }
  0x6e   : > { %2202 = vrot.lane.b32.xlu1 %v6080_v3, %s5984_s22  ;;  %2200 = vrot.lane.b32.xlu0 %v6074_v1, %s5984_s22 }
  0x72   : > { %2382 = vrot.lane.b32.xlu1 %v6082_v4, %s5985_s23  ;;  %2380 = vrot.lane.b32.xlu0 %v6076_v2, %s5985_s23 }
  0x76   : > { %2386 = vrot.lane.b32.xlu1 %v6080_v3, %s5985_s23  ;;  %2384 = vrot.lane.b32.xlu0 %v6074_v1, %s5985_s23 }
  0x7a   : > { %2566 = vrot.lane.b32.xlu1 %v6082_v4, %s5986_s27  ;;  %2564 = vrot.lane.b32.xlu0 %v6076_v2, %s5986_s27 }
  0x7e   : > { %2570 = vrot.lane.b32.xlu1 %v6080_v3, %s5986_s27  ;;  %2568 = vrot.lane.b32.xlu0 %v6074_v1, %s5986_s27  ;;  %s188_s27 = sand.u32 1, %s5963_s16  }
  0x82   : > { %2750 = vrot.lane.b32.xlu1 %v6082_v4, %s5987_s28  ;;  %2748 = vrot.lane.b32.xlu0 %v6076_v2, %s5987_s28 }
  0x86   : > { %2754 = vrot.lane.b32.xlu1 %v6080_v3, %s5987_s28  ;;  %2752 = vrot.lane.b32.xlu0 %v6074_v1, %s5987_s28  ;;  %s5603_s28 = sshll.u32 %s6040_s19, 4  ;;  %s5370_s19 = scalar_lea.sflag [#allocation3], %s188_s27 }
  0x87   : > { %s6809_s7 = scalar_lea.hbm %s6855_s4, %s5603_s28 }
  0x8a   : > { %2934 = vrot.lane.b32.xlu1 %v6082_v4, %s5988_s29  ;;  %2932 = vrot.lane.b32.xlu0 %v6076_v2, %s5988_s29 }
  0x8c   : > { %v206_v7 = vpop.permute.xlu1 %205  ;;  %v202_v8 = vpop.permute.xlu0 %201 }
  0x8e   : > { %2938 = vrot.lane.b32.xlu1 %v6080_v3, %s5988_s29  ;;  %2936 = vrot.lane.b32.xlu0 %v6074_v1, %s5988_s29  ;;  %s189_s29 = scalar_lea.vmem [#allocation2], %s188_s27 }
  0x90   : > { %v208_v9 = vpop.permute.xlu1 %207  ;;  %v204_v10 = vpop.permute.xlu0 %203 }
  0x91   : > { %v6146_v11 = vsel %vm211_vm0, %v204_v10, %v206_v7  ;;  %v6148_v12 = vsel %vm211_vm0, %v208_v9, %v202_v8  ;;  %v6150_v13 = vsel %vm211_vm0, %v202_v8, %v204_v10  ;;  %v6152_v14 = vsel %vm211_vm0, %v206_v7, %v208_v9 }
  0x92   : > { %3118 = vrot.lane.b32.xlu1 %v6082_v4, %s5989_s30  ;;  %3116 = vrot.lane.b32.xlu0 %v6076_v2, %s5989_s30  ;;  %vm3124_vm0 = vcmp.lt.s32.totalorder %v6141_v6, 47 }
  0x93   : > { %226 = vmatprep.subr.mxu0 %v6146_v11  ;;  %303 = vmatprep.subr.mxu1 %v6148_v12 }
  0x94   : > { %227 = vmatpush1.msra.mxu0 %v6150_v13  ;;  %304 = vmatpush1.msra.mxu1 %v6152_v14  ;;  %v543_v16 = vpop.permute.xlu1 %542  ;;  %v541_v17 = vpop.permute.xlu0 %540 }
  0x95   : > { %5445 = vmatmul.mubr.msk.f32.vlgmr.msra.gmra.mrb[0].mxu0 %vm219_vm1, %v5443_v15  ;;  %5447 = vmatmul.mubr.msk.f32.vlgmr.msra.gmra.mrb[0].mxu1 %vm219_vm1, %v5443_v15  ;;  %v6194_v24 = vsel %vm548_vm2, %v541_v17, %v543_v16  ;;  %v5472_v15 = vld [vmem:[%s6852_s1 + $0x58] sm:$0xff] }
  0x96   : > { %386 = vmatprep.subr.mxu0 %v6082_v4  ;;  %463 = vmatprep.subr.mxu1 %v6080_v3 }
  0x97   : > { %387 = vmatpush1.msra.mxu0 %v6076_v2  ;;  %464 = vmatpush1.msra.mxu1 %v6074_v1 }
  0x98   : > { %3122 = vrot.lane.b32.xlu1 %v6080_v3, %s5989_s30  ;;  %3120 = vrot.lane.b32.xlu0 %v6074_v1, %s5989_s30  ;;  %v547_v19 = vpop.permute.xlu1 %546  ;;  %v545_v20 = vpop.permute.xlu0 %544  ;;  %s5382_s30 = sshll.u32 %s189_s29, 4  ;;  %s6811_s30 = int_to_ptr.vmem [resolvable:$true] %s5382_s30 }
  0x99   : > { %296 = vmatprep.mubr.f32.mxu0 %v5973_v0  ;;  %373 = vmatprep.mubr.f32.mxu1 %v5973_v0  ;;  %v6179_v21 = vsel %vm548_vm2, %v543_v16, %v545_v20  ;;  %v6183_v22 = vsel %vm548_vm2, %v547_v19, %v541_v17  ;;  %v6198_v25 = vsel %vm548_vm2, %v545_v20, %v547_v19  ;;  %v5477_v20 = vld [vmem:[%s6852_s1 + $0x60] sm:$0xff]  ;;  %vm3308_vm2 = vcmp.lt.s32.totalorder %v6141_v6, 46  ;;  %s5909_s8 = scalar_lea.vmem %s6811_s30, 16  ;;  %p5916_p0 = scmp.lt.s32.totalorder %s6811_s30, %s5914_s10 }
  0x9a   : > { %5446 = vmatmul.mubr.msk.f32.gmra.mrb[2].mxu0 %vm219_vm1, %v5444_v18  ;;  %5448 = vmatmul.mubr.msk.f32.gmra.mrb[2].mxu1 %vm219_vm1, %v5444_v18  ;;  %v5537_v6 = vld [vmem:[%s6852_s1 + $0x100] sm:$0xff]  ;;  %p5910_p11 = scmp.ne.s32.totalorder %s6811_s30, %s5909_s8 }
  0x9b   : > { %562 = vmatprep.subr.mxu0 %v6179_v21  ;;  %639 = vmatprep.subr.mxu1 %v6183_v22 }
  0x9c   : > { %3302 = vrot.lane.b32.xlu1 %v6082_v4, %s5990_s11  ;;  %3300 = vrot.lane.b32.xlu0 %v6076_v2, %s5990_s11  ;;  %v727_v26 = vpop.permute.xlu1 %726  ;;  %v725_v27 = vpop.permute.xlu0 %724  ;;  %p5911_p12 = pnand %p5910_p11, %p6057_p5 }
  0x9d   : > { %450 = vmatprep.mubr.f32.mxu0 %v5973_v0  ;;  %527 = vmatprep.mubr.f32.mxu1 %v5973_v0  ;;  %v6233_v34 = vsel %vm732_vm3, %v725_v27, %v727_v26 }
  0x9e   : > { %5449 = vmatmul.mubr.msk.f32.vlgmr.msra.gmra.mrb[0].mxu0 %vm219_vm1, %v199_v23  ;;  %5451 = vmatmul.mubr.msk.f32.vlgmr.msra.gmra.mrb[0].mxu1 %vm219_vm1, %v199_v23  ;;  %p5912_p13 = pneg %p5911_p12 }
  0x9f   : > { %563 = vmatpush1.msra.mxu0 %v6194_v24  ;;  %640 = vmatpush1.msra.mxu1 %v6198_v25 }
  0xa0   : > { %3306 = vrot.lane.b32.xlu1 %v6080_v3, %s5990_s11  ;;  %3304 = vrot.lane.b32.xlu0 %v6074_v1, %s5990_s11  ;;  %v731_v29 = vpop.permute.xlu1 %730  ;;  %v729_v30 = vpop.permute.xlu0 %728  ;;  %s5915_s11 = scalar_lea.vmem %s5914_s10, 32 }
  0xa1   : > { %456 = vmatprep.mubr.f32.mxu0 %v5973_v0  ;;  %533 = vmatprep.mubr.f32.mxu1 %v5973_v0  ;;  %v6218_v31 = vsel %vm732_vm3, %v727_v26, %v729_v30  ;;  %v6222_v32 = vsel %vm732_vm3, %v731_v29, %v725_v27  ;;  %v6237_v35 = vsel %vm732_vm3, %v729_v30, %v731_v29  ;;  %v5478_v29 = vld [vmem:[%s6852_s1 + $0x68] sm:$0xff]  ;;  %p5917_p1 = scmp.lt.s32.totalorder %s5915_s11, %s5909_s8 }
  0xa2   : > { %5450 = vmatmul.mubr.msk.f32.gmra.mrb[2].mxu0 %vm219_vm1, %v200_v28  ;;  %5452 = vmatmul.mubr.msk.f32.gmra.mrb[2].mxu1 %vm219_vm1, %v200_v28 }
  0xa3   : > { %746 = vmatprep.subr.mxu0 %v6218_v31  ;;  %823 = vmatprep.subr.mxu1 %v6222_v32  ;;  %p5918_p2 = por %p5917_p1, %p5916_p0 }
  0xa4   : > { %626 = vmatprep.mubr.f32.mxu0 %v5973_v0  ;;  %703 = vmatprep.mubr.f32.mxu1 %v5973_v0  ;;  %v911_v36 = vpop.permute.xlu1 %910  ;;  %v909_v37 = vpop.permute.xlu0 %908 }
  0xa5   : > { %v6268_v44 = vsel %vm916_vm4, %v909_v37, %v911_v36  ;;  %p5919_p3 = pnand %p5918_p2, %p5912_p13 }
  0xa6   : > { %5455 = vmatmul.mubr.msk.f32.vlgmr.msra.gmra.mrb[0].mxu0 %vm219_vm1, %v5453_v33  ;;  %5457 = vmatmul.mubr.msk.f32.vlgmr.msra.gmra.mrb[0].mxu1 %vm219_vm1, %v5453_v33 }
  0xa7   : > { %747 = vmatpush1.msra.mxu0 %v6233_v34  ;;  %824 = vmatpush1.msra.mxu1 %v6237_v35 }
  0xa8   : > { %632 = vmatprep.mubr.f32.mxu0 %v5973_v0  ;;  %709 = vmatprep.mubr.f32.mxu1 %v5973_v0  ;;  %v915_v39 = vpop.permute.xlu1 %914  ;;  %v913_v40 = vpop.permute.xlu0 %912 }
  0xa9   : > { %v6253_v41 = vsel %vm916_vm4, %v911_v36, %v913_v40  ;;  %v6257_v42 = vsel %vm916_vm4, %v915_v39, %v909_v37  ;;  %v6272_v45 = vsel %vm916_vm4, %v913_v40, %v915_v39 }
  0xaa   : > { %5456 = vmatmul.mubr.msk.f32.gmra.mrb[2].mxu0 %vm219_vm1, %v5454_v38  ;;  %5458 = vmatmul.mubr.msk.f32.gmra.mrb[2].mxu1 %vm219_vm1, %v5454_v38  ;;  %v5483_v38 = vld [vmem:[%s6852_s1 + $0x70] sm:$0xff] }
  0xab   : > { %930 = vmatprep.subr.mxu0 %v6253_v41  ;;  %1007 = vmatprep.subr.mxu1 %v6257_v42 }
  0xac   : > { %810 = vmatprep.mubr.f32.mxu0 %v5973_v0  ;;  %887 = vmatprep.mubr.f32.mxu1 %v5973_v0  ;;  %v1095_v46 = vpop.permute.xlu1 %1094  ;;  %v1093_v47 = vpop.permute.xlu0 %1092 }
  0xad   : > { %v6303_v54 = vsel %vm1100_vm5, %v1093_v47, %v1095_v46 }
  0xae   : > { %5461 = vmatmul.mubr.msk.f32.vlgmr.msra.gmra.mrb[0].mxu0 %vm219_vm1, %v5459_v43  ;;  %5463 = vmatmul.mubr.msk.f32.vlgmr.msra.gmra.mrb[0].mxu1 %vm219_vm1, %v5459_v43 }
  0xaf   : > { %931 = vmatpush1.msra.mxu0 %v6268_v44  ;;  %1008 = vmatpush1.msra.mxu1 %v6272_v45 }
  0xb0   : > { %816 = vmatprep.mubr.f32.mxu0 %v5973_v0  ;;  %893 = vmatprep.mubr.f32.mxu1 %v5973_v0  ;;  %v1099_v49 = vpop.permute.xlu1 %1098  ;;  %v1097_v50 = vpop.permute.xlu0 %1096 }
  0xb1   : > { %v6288_v51 = vsel %vm1100_vm5, %v1095_v46, %v1097_v50  ;;  %v6292_v52 = vsel %vm1100_vm5, %v1099_v49, %v1093_v47  ;;  %v6307_v55 = vsel %vm1100_vm5, %v1097_v50, %v1099_v49  ;;  %v5484_v47 = vld [vmem:[%s6852_s1 + $0x78] sm:$0xff] }
  0xb2   : > { %5462 = vmatmul.mubr.msk.f32.gmra.mrb[2].mxu0 %vm219_vm1, %v5460_v48  ;;  %5464 = vmatmul.mubr.msk.f32.gmra.mrb[2].mxu1 %vm219_vm1, %v5460_v48 }
  0xb3   : > { %1114 = vmatprep.subr.mxu0 %v6288_v51  ;;  %1191 = vmatprep.subr.mxu1 %v6292_v52 }
  0xb4   : > { %994 = vmatprep.mubr.f32.mxu0 %v5973_v0  ;;  %1071 = vmatprep.mubr.f32.mxu1 %v5973_v0  ;;  %v1279_v56 = vpop.permute.xlu1 %1278  ;;  %v1277_v57 = vpop.permute.xlu0 %1276 }
  0xb5   : > { %v6338_v7 = vsel %vm1284_vm6, %v1277_v57, %v1279_v56 }
  0xb6   : > { %5467 = vmatmul.mubr.msk.f32.vlgmr.msra.gmra.mrb[0].mxu0 %vm219_vm1, %v5465_v53  ;;  %5469 = vmatmul.mubr.msk.f32.vlgmr.msra.gmra.mrb[0].mxu1 %vm219_vm1, %v5465_v53 }
  0xb7   : > { %1115 = vmatpush1.msra.mxu0 %v6303_v54  ;;  %1192 = vmatpush1.msra.mxu1 %v6307_v55 }
  0xb8   : > { %1000 = vmatprep.mubr.f32.mxu0 %v5973_v0  ;;  %1077 = vmatprep.mubr.f32.mxu1 %v5973_v0  ;;  %v1283_v59 = vpop.permute.xlu1 %1282  ;;  %v1281_v60 = vpop.permute.xlu0 %1280 }
  0xb9   : > { %v6323_v61 = vsel %vm1284_vm6, %v1279_v56, %v1281_v60  ;;  %v6327_v62 = vsel %vm1284_vm6, %v1283_v59, %v1277_v57  ;;  %v6342_v8 = vsel %vm1284_vm6, %v1281_v60, %v1283_v59  ;;  %v5489_v56 = vld [vmem:[%s6852_s1 + $0x80] sm:$0xff] }
  0xba   : > { %5468 = vmatmul.mubr.msk.f32.gmra.mrb[2].mxu0 %vm219_vm1, %v5466_v58  ;;  %5470 = vmatmul.mubr.msk.f32.gmra.mrb[2].mxu1 %vm219_vm1, %v5466_v58 }
  0xbb   : > { %1298 = vmatprep.subr.mxu0 %v6323_v61  ;;  %1375 = vmatprep.subr.mxu1 %v6327_v62 }
  0xbc   : > { %1178 = vmatprep.mubr.f32.mxu0 %v5973_v0  ;;  %1255 = vmatprep.mubr.f32.mxu1 %v5973_v0  ;;  %v1463_v9 = vpop.permute.xlu1 %1462  ;;  %v1461_v10 = vpop.permute.xlu0 %1460 }
  0xbd   : > { %v6373_v23 = vsel %vm1468_vm7, %v1461_v10, %v1463_v9 }
  0xbe   : > { %5473 = vmatmul.mubr.msk.f32.vlgmr.msra.gmra.mrb[0].mxu0 %vm219_vm1, %v5471_v63  ;;  %5475 = vmatmul.mubr.msk.f32.vlgmr.msra.gmra.mrb[0].mxu1 %vm219_vm1, %v5471_v63  ;;  %v5490_v63 = vld [vmem:[%s6852_s1 + $0x88] sm:$0xff] }
  0xbf   : > { %1299 = vmatpush1.msra.mxu0 %v6338_v7  ;;  %1376 = vmatpush1.msra.mxu1 %v6342_v8 }
  0xc0   : > { %1184 = vmatprep.mubr.f32.mxu0 %v5973_v0  ;;  %1261 = vmatprep.mubr.f32.mxu1 %v5973_v0  ;;  %v1467_v16 = vpop.permute.xlu1 %1466  ;;  %v1465_v17 = vpop.permute.xlu0 %1464 }
  0xc1   : > { %v6358_v18 = vsel %vm1468_vm7, %v1463_v9, %v1465_v17  ;;  %v6362_v19 = vsel %vm1468_vm7, %v1467_v16, %v1461_v10  ;;  %v6377_v26 = vsel %vm1468_vm7, %v1465_v17, %v1467_v16  ;;  %v5495_v17 = vld [vmem:[%s6852_s1 + $0x90] sm:$0xff] }
  0xc2   : > { %5474 = vmatmul.mubr.msk.f32.gmra.mrb[2].mxu0 %vm219_vm1, %v5472_v15  ;;  %5476 = vmatmul.mubr.msk.f32.gmra.mrb[2].mxu1 %vm219_vm1, %v5472_v15 }
  0xc3   : > { %1482 = vmatprep.subr.mxu0 %v6358_v18  ;;  %1559 = vmatprep.subr.mxu1 %v6362_v19 }
  0xc4   : > { %1362 = vmatprep.mubr.f32.mxu0 %v5973_v0  ;;  %1439 = vmatprep.mubr.f32.mxu1 %v5973_v0  ;;  %v1647_v27 = vpop.permute.xlu1 %1646  ;;  %v1645_v28 = vpop.permute.xlu0 %1644 }
  0xc5   : > { %v6408_v39 = vsel %vm1652_vm8, %v1645_v28, %v1647_v27 }
  0xc6   : > { %5479 = vmatmul.mubr.msk.f32.vlgmr.msra.gmra.mrb[0].mxu0 %vm219_vm1, %v5477_v20  ;;  %5481 = vmatmul.mubr.msk.f32.vlgmr.msra.gmra.mrb[0].mxu1 %vm219_vm1, %v5477_v20 }
  0xc7   : > { %1483 = vmatpush1.msra.mxu0 %v6373_v23  ;;  %1560 = vmatpush1.msra.mxu1 %v6377_v26 }
  0xc8   : > { %1368 = vmatprep.mubr.f32.mxu0 %v5973_v0  ;;  %1445 = vmatprep.mubr.f32.mxu1 %v5973_v0  ;;  %v1651_v30 = vpop.permute.xlu1 %1650  ;;  %v1649_v33 = vpop.permute.xlu0 %1648 }
  0xc9   : > { %v6393_v36 = vsel %vm1652_vm8, %v1647_v27, %v1649_v33  ;;  %v6397_v37 = vsel %vm1652_vm8, %v1651_v30, %v1645_v28  ;;  %v6412_v40 = vsel %vm1652_vm8, %v1649_v33, %v1651_v30  ;;  %v5496_v30 = vld [vmem:[%s6852_s1 + $0x98] sm:$0xff] }
  0xca   : > { %5480 = vmatmul.mubr.msk.f32.gmra.mrb[2].mxu0 %vm219_vm1, %v5478_v29  ;;  %5482 = vmatmul.mubr.msk.f32.gmra.mrb[2].mxu1 %vm219_vm1, %v5478_v29 }
  0xcb   : > { %1666 = vmatprep.subr.mxu0 %v6393_v36  ;;  %1743 = vmatprep.subr.mxu1 %v6397_v37 }
  0xcc   : > { %1546 = vmatprep.mubr.f32.mxu0 %v5973_v0  ;;  %1623 = vmatprep.mubr.f32.mxu1 %v5973_v0  ;;  %v1831_v43 = vpop.permute.xlu1 %1830  ;;  %v1829_v46 = vpop.permute.xlu0 %1828 }
  0xcd   : > { %v1839_v57 = vsel %vm1836_vm9, %v1829_v46, %v1831_v43 }
  0xce   : > { %5485 = vmatmul.mubr.msk.f32.vlgmr.msra.gmra.mrb[0].mxu0 %vm219_vm1, %v5483_v38  ;;  %5487 = vmatmul.mubr.msk.f32.vlgmr.msra.gmra.mrb[0].mxu1 %vm219_vm1, %v5483_v38 }
  0xcf   : > { %1667 = vmatpush1.msra.mxu0 %v6408_v39  ;;  %1744 = vmatpush1.msra.mxu1 %v6412_v40 }
  0xd0   : > { %1552 = vmatprep.mubr.f32.mxu0 %v5973_v0  ;;  %1629 = vmatprep.mubr.f32.mxu1 %v5973_v0  ;;  %v1835_v48 = vpop.permute.xlu1 %1834  ;;  %v1833_v49 = vpop.permute.xlu0 %1832 }
  0xd1   : > { %v1838_v50 = vsel %vm1836_vm9, %v1831_v43, %v1833_v49  ;;  %v1840_v53 = vsel %vm1836_vm9, %v1835_v48, %v1829_v46  ;;  %v1837_v58 = vsel %vm1836_vm9, %v1833_v49, %v1835_v48 }
  0xd2   : > { %5486 = vmatmul.mubr.msk.f32.gmra.mrb[2].mxu0 %vm219_vm1, %v5484_v47  ;;  %5488 = vmatmul.mubr.msk.f32.gmra.mrb[2].mxu1 %vm219_vm1, %v5484_v47  ;;  %v5501_v47 = vld [vmem:[%s6852_s1 + $0xa0] sm:$0xff] }
  0xd3   : > { %1850 = vmatprep.subr.mxu0 %v1838_v50  ;;  %1927 = vmatprep.subr.mxu1 %v1840_v53 }
  0xd4   : > { %1730 = vmatprep.mubr.f32.mxu0 %v5973_v0  ;;  %1807 = vmatprep.mubr.f32.mxu1 %v5973_v0  ;;  %v2015_v59 = vpop.permute.xlu1 %2014  ;;  %v2013_v60 = vpop.permute.xlu0 %2012 }
  0xd5   : > { %v2023_v20 = vsel %vm2020_vm10, %v2013_v60, %v2015_v59 }
  0xd6   : > { %5491 = vmatmul.mubr.msk.f32.vlgmr.msra.gmra.mrb[0].mxu0 %vm219_vm1, %v5489_v56  ;;  %5493 = vmatmul.mubr.msk.f32.vlgmr.msra.gmra.mrb[0].mxu1 %vm219_vm1, %v5489_v56  ;;  %v5502_v56 = vld [vmem:[%s6852_s1 + $0xa8] sm:$0xff] }
  0xd7   : > { %1851 = vmatpush1.msra.mxu0 %v1839_v57  ;;  %1928 = vmatpush1.msra.mxu1 %v1837_v58 }
  0xd8   : > { %1736 = vmatprep.mubr.f32.mxu0 %v5973_v0  ;;  %1813 = vmatprep.mubr.f32.mxu1 %v5973_v0  ;;  %v2019_v9 = vpop.permute.xlu1 %2018  ;;  %v2017_v10 = vpop.permute.xlu0 %2016 }
  0xd9   : > { %v2022_v15 = vsel %vm2020_vm10, %v2015_v59, %v2017_v10  ;;  %v2024_v16 = vsel %vm2020_vm10, %v2019_v9, %v2013_v60  ;;  %v2021_v27 = vsel %vm2020_vm10, %v2017_v10, %v2019_v9 }
  0xda   : > { %5492 = vmatmul.mubr.msk.f32.gmra.mrb[2].mxu0 %vm219_vm1, %v5490_v63  ;;  %5494 = vmatmul.mubr.msk.f32.gmra.mrb[2].mxu1 %vm219_vm1, %v5490_v63  ;;  %v5507_v63 = vld [vmem:[%s6852_s1 + $0xb0] sm:$0xff] }
  0xdb   : > { %2034 = vmatprep.subr.mxu0 %v2022_v15  ;;  %2111 = vmatprep.subr.mxu1 %v2024_v16 }
  0xdc   : > { %1914 = vmatprep.mubr.f32.mxu0 %v5973_v0  ;;  %1991 = vmatprep.mubr.f32.mxu1 %v5973_v0  ;;  %v2199_v28 = vpop.permute.xlu1 %2198  ;;  %v2197_v29 = vpop.permute.xlu0 %2196 }
  0xdd   : > { %v2207_v48 = vsel %vm2204_vm11, %v2197_v29, %v2199_v28 }
  0xde   : > { %5497 = vmatmul.mubr.msk.f32.vlgmr.msra.gmra.mrb[0].mxu0 %vm219_vm1, %v5495_v17  ;;  %5499 = vmatmul.mubr.msk.f32.vlgmr.msra.gmra.mrb[0].mxu1 %vm219_vm1, %v5495_v17  ;;  %v5991_v17 = vmov 0  }
  0xdf   : > { %2035 = vmatpush1.msra.mxu0 %v2023_v20  ;;  %2112 = vmatpush1.msra.mxu1 %v2021_v27  ;;  %v5023_v20 = vld [vmem:[%s6853_s2] sm:$0xff]  ;;  %v5024_v27 = vld [vmem:[%s6853_s2 + $0x8] sm:$0xff] }
  0xe0   : > { %1920 = vmatprep.mubr.f32.mxu0 %v5973_v0  ;;  %1997 = vmatprep.mubr.f32.mxu1 %v5973_v0  ;;  %v2203_v33 = vpop.permute.xlu1 %2202  ;;  %v2201_v38 = vpop.permute.xlu0 %2200 }
  0xe1   : > { %v2206_v43 = vsel %vm2204_vm11, %v2199_v28, %v2201_v38  ;;  %v2208_v46 = vsel %vm2204_vm11, %v2203_v33, %v2197_v29  ;;  %v2205_v49 = vsel %vm2204_vm11, %v2201_v38, %v2203_v33  ;;  %5883 = vset.pattern.permute.xlu0 %v5991_v17  ;;  %5884 = vset.pattern.permute.xlu1 %v5991_v17  ;;  %v5508_v28 = vld [vmem:[%s6852_s1 + $0xb8] sm:$0xff] }
  0xe2   : > { %5498 = vmatmul.mubr.msk.f32.gmra.mrb[2].mxu0 %vm219_vm1, %v5496_v30  ;;  %5500 = vmatmul.mubr.msk.f32.gmra.mrb[2].mxu1 %vm219_vm1, %v5496_v30 }
  0xe3   : > { %2218 = vmatprep.subr.mxu0 %v2206_v43  ;;  %2295 = vmatprep.subr.mxu1 %v2208_v46  ;;  %v5513_v43 = vld [vmem:[%s6852_s1 + $0xc0] sm:$0xff] }
  0xe4   : > { %2098 = vmatprep.mubr.f32.mxu0 %v5973_v0  ;;  %2175 = vmatprep.mubr.f32.mxu1 %v5973_v0  ;;  %v2383_v50 = vpop.permute.xlu1 %2382  ;;  %v2381_v53 = vpop.permute.xlu0 %2380 }
  0xe5   : > { %v2391_v9 = vsel %vm2388_vm12, %v2381_v53, %v2383_v50  ;;  %5027 = vperm.xlu0 %5883, %v5023_v20   ;;  %5032 = vperm.xlu1 %5884, %v5024_v27  }
  0xe6   : > { %5503 = vmatmul.mubr.msk.f32.vlgmr.msra.gmra.mrb[0].mxu0 %vm219_vm1, %v5501_v47  ;;  %5505 = vmatmul.mubr.msk.f32.vlgmr.msra.gmra.mrb[0].mxu1 %vm219_vm1, %v5501_v47 }
  0xe7   : > { %2219 = vmatpush1.msra.mxu0 %v2207_v48  ;;  %2296 = vmatpush1.msra.mxu1 %v2205_v49 }
  0xe8   : > { %2104 = vmatprep.mubr.f32.mxu0 %v5973_v0  ;;  %2181 = vmatprep.mubr.f32.mxu1 %v5973_v0  ;;  %v2387_v57 = vpop.permute.xlu1 %2386  ;;  %v2385_v58 = vpop.permute.xlu0 %2384 }
  0xe9   : > { %v2390_v59 = vsel %vm2388_vm12, %v2383_v50, %v2385_v58  ;;  %v2392_v60 = vsel %vm2388_vm12, %v2387_v57, %v2381_v53  ;;  %v2389_v10 = vsel %vm2388_vm12, %v2385_v58, %v2387_v57  ;;  %v5514_v50 = vld [vmem:[%s6852_s1 + $0xc8] sm:$0xff] }
  0xea   : > { %5504 = vmatmul.mubr.msk.f32.gmra.mrb[2].mxu0 %vm219_vm1, %v5502_v56  ;;  %5506 = vmatmul.mubr.msk.f32.gmra.mrb[2].mxu1 %vm219_vm1, %v5502_v56 }
  0xeb   : > { %2402 = vmatprep.subr.mxu0 %v2390_v59  ;;  %2479 = vmatprep.subr.mxu1 %v2392_v60  ;;  %v5519_v59 = vld [vmem:[%s6852_s1 + $0xd0] sm:$0xff] }
  0xec   : > { %2282 = vmatprep.mubr.f32.mxu0 %v5973_v0  ;;  %2359 = vmatprep.mubr.f32.mxu1 %v5973_v0  ;;  %v2567_v15 = vpop.permute.xlu1 %2566  ;;  %v2565_v16 = vpop.permute.xlu0 %2564 }
  0xed   : > { %v2575_v46 = vsel %vm2572_vm13, %v2565_v16, %v2567_v15 }
  0xee   : > { %5509 = vmatmul.mubr.msk.f32.vlgmr.msra.gmra.mrb[0].mxu0 %vm219_vm1, %v5507_v63  ;;  %5511 = vmatmul.mubr.msk.f32.vlgmr.msra.gmra.mrb[0].mxu1 %vm219_vm1, %v5507_v63 }
  0xef   : > { %2403 = vmatpush1.msra.mxu0 %v2391_v9  ;;  %2480 = vmatpush1.msra.mxu1 %v2389_v10 }
  0xf0   : > { %2288 = vmatprep.mubr.f32.mxu0 %v5973_v0  ;;  %2365 = vmatprep.mubr.f32.mxu1 %v5973_v0  ;;  %v2571_v29 = vpop.permute.xlu1 %2570  ;;  %v2569_v30 = vpop.permute.xlu0 %2568 }
  0xf1   : > { %v2574_v33 = vsel %vm2572_vm13, %v2567_v15, %v2569_v30  ;;  %v2576_v38 = vsel %vm2572_vm13, %v2571_v29, %v2565_v16  ;;  %v2573_v47 = vsel %vm2572_vm13, %v2569_v30, %v2571_v29  ;;  %v5520_v15 = vld [vmem:[%s6852_s1 + $0xd8] sm:$0xff] }
  0xf2   : > { %5510 = vmatmul.mubr.msk.f32.gmra.mrb[2].mxu0 %vm219_vm1, %v5508_v28  ;;  %5512 = vmatmul.mubr.msk.f32.gmra.mrb[2].mxu1 %vm219_vm1, %v5508_v28  ;;  %v5525_v28 = vld [vmem:[%s6852_s1 + $0xe0] sm:$0xff] }
  0xf3   : > { %2586 = vmatprep.subr.mxu0 %v2574_v33  ;;  %2663 = vmatprep.subr.mxu1 %v2576_v38 }
  0xf4   : > { %2466 = vmatprep.mubr.f32.mxu0 %v5973_v0  ;;  %2543 = vmatprep.mubr.f32.mxu1 %v5973_v0  ;;  %v2751_v48 = vpop.permute.xlu1 %2750  ;;  %v2749_v49 = vpop.permute.xlu0 %2748 }
  0xf5   : > { %v2759_v60 = vsel %vm2756_vm14, %v2749_v49, %v2751_v48 }
  0xf6   : > { %5515 = vmatmul.mubr.msk.f32.vlgmr.msra.gmra.mrb[0].mxu0 %vm219_vm1, %v5513_v43  ;;  %5517 = vmatmul.mubr.msk.f32.vlgmr.msra.gmra.mrb[0].mxu1 %vm219_vm1, %v5513_v43  ;;  %v5526_v43 = vld [vmem:[%s6852_s1 + $0xe8] sm:$0xff] }
  0xf7   : > { %2587 = vmatpush1.msra.mxu0 %v2575_v46  ;;  %2664 = vmatpush1.msra.mxu1 %v2573_v47 }
  0xf8   : > { %2472 = vmatprep.mubr.f32.mxu0 %v5973_v0  ;;  %2549 = vmatprep.mubr.f32.mxu1 %v5973_v0  ;;  %v2755_v53 = vpop.permute.xlu1 %2754  ;;  %v2753_v56 = vpop.permute.xlu0 %2752 }
  0xf9   : > { %v2758_v57 = vsel %vm2756_vm14, %v2751_v48, %v2753_v56  ;;  %v2760_v58 = vsel %vm2756_vm14, %v2755_v53, %v2749_v49  ;;  %v2757_v63 = vsel %vm2756_vm14, %v2753_v56, %v2755_v53 }
  0xfa   : > { %5516 = vmatmul.mubr.msk.f32.gmra.mrb[2].mxu0 %vm219_vm1, %v5514_v50  ;;  %5518 = vmatmul.mubr.msk.f32.gmra.mrb[2].mxu1 %vm219_vm1, %v5514_v50  ;;  %v5531_v50 = vld [vmem:[%s6852_s1 + $0xf0] sm:$0xff] }
  0xfb   : > { %2770 = vmatprep.subr.mxu0 %v2758_v57  ;;  %2847 = vmatprep.subr.mxu1 %v2760_v58 }
  0xfc   : > { %2650 = vmatprep.mubr.f32.mxu0 %v5973_v0  ;;  %2727 = vmatprep.mubr.f32.mxu1 %v5973_v0  ;;  %v2935_v9 = vpop.permute.xlu1 %2934  ;;  %v2933_v10 = vpop.permute.xlu0 %2932 }
  0xfd   : > { %v2943_v29 = vsel %vm2940_vm15, %v2933_v10, %v2935_v9 }
  0xfe   : > { %5521 = vmatmul.mubr.msk.f32.vlgmr.msra.gmra.mrb[0].mxu0 %vm219_vm1, %v5519_v59  ;;  %5523 = vmatmul.mubr.msk.f32.vlgmr.msra.gmra.mrb[0].mxu1 %vm219_vm1, %v5519_v59  ;;  %v5532_v59 = vld [vmem:[%s6852_s1 + $0xf8] sm:$0xff] }
  0xff   : > { %2771 = vmatpush1.msra.mxu0 %v2759_v60  ;;  %2848 = vmatpush1.msra.mxu1 %v2757_v63 }
 0x100   : > { %2656 = vmatprep.mubr.f32.mxu0 %v5973_v0  ;;  %2733 = vmatprep.mubr.f32.mxu1 %v5973_v0  ;;  %v2939_v16 = vpop.permute.xlu1 %2938  ;;  %v2937_v17 = vpop.permute.xlu0 %2936 }
 0x101   : > { %v2942_v20 = vsel %vm2940_vm15, %v2935_v9, %v2937_v17  ;;  %v2944_v27 = vsel %vm2940_vm15, %v2939_v16, %v2933_v10  ;;  %v2941_v30 = vsel %vm2940_vm15, %v2937_v17, %v2939_v16  ;;  %v5538_v17 = vld [vmem:[%s6852_s1 + $0x108] sm:$0xff] }
 0x102   : > { %5522 = vmatmul.mubr.msk.f32.gmra.mrb[2].mxu0 %vm219_vm1, %v5520_v15  ;;  %5524 = vmatmul.mubr.msk.f32.gmra.mrb[2].mxu1 %vm219_vm1, %v5520_v15 }
 0x103   : > { %2954 = vmatprep.subr.mxu0 %v2942_v20  ;;  %3031 = vmatprep.subr.mxu1 %v2944_v27  ;;  %v5543_v20 = vld [vmem:[%s6852_s1 + $0x110] sm:$0xff] }
 0x104   : > { %2834 = vmatprep.mubr.f32.mxu0 %v5973_v0  ;;  %2911 = vmatprep.mubr.f32.mxu1 %v5973_v0  ;;  %v3119_v33 = vpop.permute.xlu1 %3118  ;;  %v3117_v38 = vpop.permute.xlu0 %3116 }
 0x105   : > { %v3127_v53 = vsel %vm3124_vm0, %v3117_v38, %v3119_v33 }
 0x106   : > { %5527 = vmatmul.mubr.msk.f32.vlgmr.msra.gmra.mrb[0].mxu0 %vm219_vm1, %v5525_v28  ;;  %5529 = vmatmul.mubr.msk.f32.vlgmr.msra.gmra.mrb[0].mxu1 %vm219_vm1, %v5525_v28 }
 0x107   : > { %2955 = vmatpush1.msra.mxu0 %v2943_v29  ;;  %3032 = vmatpush1.msra.mxu1 %v2941_v30 }
 0x108   : > { %2840 = vmatprep.mubr.f32.mxu0 %v5973_v0  ;;  %2917 = vmatprep.mubr.f32.mxu1 %v5973_v0 }
 0x10a   : > { %v3123_v46 = vpop.permute.xlu1 %3122  ;;  %5528 = vmatmul.mubr.msk.f32.gmra.mrb[2].mxu0 %vm219_vm1, %v5526_v43  ;;  %5530 = vmatmul.mubr.msk.f32.gmra.mrb[2].mxu1 %vm219_vm1, %v5526_v43  ;;  %v3121_v47 = vpop.permute.xlu0 %3120 }
 0x10b   : > { %v3126_v48 = vsel %vm3124_vm0, %v3119_v33, %v3121_v47  ;;  %v3128_v49 = vsel %vm3124_vm0, %v3123_v46, %v3117_v38  ;;  %3018 = vmatprep.mubr.f32.mxu0 %v5973_v0  ;;  %3095 = vmatprep.mubr.f32.mxu1 %v5973_v0  ;;  %v3125_v56 = vsel %vm3124_vm0, %v3121_v47, %v3123_v46 }
 0x10c   : > { %3138 = vmatprep.subr.mxu0 %v3126_v48  ;;  %3215 = vmatprep.subr.mxu1 %v3128_v49 }
 0x10e   : > { %v3303_v57 = vpop.permute.xlu1 %3302  ;;  %5533 = vmatmul.mubr.msk.f32.vlgmr.msra.gmra.mrb[0].mxu0 %vm219_vm1, %v5531_v50  ;;  %5535 = vmatmul.mubr.msk.f32.vlgmr.msra.gmra.mrb[0].mxu1 %vm219_vm1, %v5531_v50  ;;  %v3301_v58 = vpop.permute.xlu0 %3300 }
 0x10f   : > { %3139 = vmatpush1.msra.mxu0 %v3127_v53  ;;  %3216 = vmatpush1.msra.mxu1 %v3125_v56  ;;  %v3311_v15 = vsel %vm3308_vm2, %v3301_v58, %v3303_v57 }
 0x110   : > { %3024 = vmatprep.mubr.f32.mxu0 %v5973_v0  ;;  %3101 = vmatprep.mubr.f32.mxu1 %v5973_v0 }
 0x112   : > { %v3307_v60 = vpop.permute.xlu1 %3306  ;;  %5534 = vmatmul.mubr.msk.f32.gmra.mrb[2].mxu0 %vm219_vm1, %v5532_v59  ;;  %5536 = vmatmul.mubr.msk.f32.gmra.mrb[2].mxu1 %vm219_vm1, %v5532_v59  ;;  %v3305_v63 = vpop.permute.xlu0 %3304 }
 0x113   : > { %v3310_v9 = vsel %vm3308_vm2, %v3303_v57, %v3305_v63  ;;  %v3312_v10 = vsel %vm3308_vm2, %v3307_v60, %v3301_v58  ;;  %3202 = vmatprep.mubr.f32.mxu0 %v5973_v0  ;;  %3279 = vmatprep.mubr.f32.mxu1 %v5973_v0  ;;  %v3309_v16 = vsel %vm3308_vm2, %v3305_v63, %v3307_v60 }
 0x114   : > { %3322 = vmatprep.subr.mxu0 %v3310_v9  ;;  %3399 = vmatprep.subr.mxu1 %v3312_v10 }
 0x116   : > { %5539 = vmatmul.mubr.msk.f32.vlgmr.msra.gmra.mrb[0].mxu0 %vm219_vm1, %v5537_v6  ;;  %5541 = vmatmul.mubr.msk.f32.vlgmr.msra.gmra.mrb[0].mxu1 %vm219_vm1, %v5537_v6 }
 0x117   : > { %3323 = vmatpush1.msra.mxu0 %v3311_v15  ;;  %3400 = vmatpush1.msra.mxu1 %v3309_v16 }
 0x118   : > { %3208 = vmatprep.mubr.f32.mxu0 %v5973_v0  ;;  %3285 = vmatprep.mubr.f32.mxu1 %v5973_v0 }
 0x119   : > { %3493 = vmatprep.subr.mxu0 %v6074_v1  ;;  %3570 = vmatprep.subr.mxu1 %v6076_v2  ;;  %v5544_v1 = vld [vmem:[%s6852_s1 + $0x118] sm:$0xff]  ;;  %v5549_v2 = vld [vmem:[%s6852_s1 + $0x120] sm:$0xff] }
 0x11a   : > { %5540 = vmatmul.mubr.msk.f32.gmra.mrb[2].mxu0 %vm219_vm1, %v5538_v17  ;;  %5542 = vmatmul.mubr.msk.f32.gmra.mrb[2].mxu1 %vm219_vm1, %v5538_v17 }
 0x11b   : > { %3386 = vmatprep.mubr.f32.mxu0 %v5973_v0  ;;  %3463 = vmatprep.mubr.f32.mxu1 %v5973_v0 }
 0x11e   : > { %5545 = vmatmul.mubr.msk.f32.vlgmr.msra.gmra.mrb[0].mxu0 %vm219_vm1, %v5543_v20  ;;  %5547 = vmatmul.mubr.msk.f32.vlgmr.msra.gmra.mrb[0].mxu1 %vm219_vm1, %v5543_v20 }
 0x11f   : > { %3494 = vmatpush1.msra.mxu0 %v6082_v4  ;;  %3571 = vmatpush1.msra.mxu1 %v6080_v3  ;;  %v5550_v3 = vld [vmem:[%s6852_s1 + $0x128] sm:$0xff]  ;;  %v5555_v4 = vld [vmem:[%s6852_s1 + $0x130] sm:$0xff] }
 0x120   : > { %3664 = vmatprep.subr.mxu0 %v6152_v14  ;;  %3741 = vmatprep.subr.mxu1 %v6150_v13  ;;  %v5562_v13 = vld [vmem:[%s6852_s1 + $0x148] sm:$0xff]  ;;  %v5567_v14 = vld [vmem:[%s6852_s1 + $0x150] sm:$0xff] }
 0x121   : > { %3392 = vmatprep.mubr.f32.mxu0 %v5973_v0  ;;  %3469 = vmatprep.mubr.f32.mxu1 %v5973_v0 }
 0x122   : > { %5546 = vmatmul.mubr.msk.f32.gmra.mrb[2].mxu0 %vm219_vm1, %v5544_v1  ;;  %5548 = vmatmul.mubr.msk.f32.gmra.mrb[2].mxu1 %vm219_vm1, %v5544_v1 }
 0x123   : > { %3557 = vmatprep.mubr.f32.mxu0 %v5973_v0  ;;  %3634 = vmatprep.mubr.f32.mxu1 %v5973_v0 }
 0x126   : > { %5551 = vmatmul.mubr.msk.f32.vlgmr.msra.gmra.mrb[0].mxu0 %vm219_vm1, %v5549_v2  ;;  %5553 = vmatmul.mubr.msk.f32.vlgmr.msra.gmra.mrb[0].mxu1 %vm219_vm1, %v5549_v2 }
 0x127   : > { %3665 = vmatpush1.msra.mxu0 %v6146_v11  ;;  %3742 = vmatpush1.msra.mxu1 %v6148_v12  ;;  %v5556_v11 = vld [vmem:[%s6852_s1 + $0x138] sm:$0xff]  ;;  %v5561_v12 = vld [vmem:[%s6852_s1 + $0x140] sm:$0xff] }
 0x128   : > { %3835 = vmatprep.subr.mxu0 %v6198_v25  ;;  %3912 = vmatprep.subr.mxu1 %v6194_v24  ;;  %v5574_v24 = vld [vmem:[%s6852_s1 + $0x168] sm:$0xff]  ;;  %v5579_v25 = vld [vmem:[%s6852_s1 + $0x170] sm:$0xff] }
 0x129   : > { %3563 = vmatprep.mubr.f32.mxu0 %v5973_v0  ;;  %3640 = vmatprep.mubr.f32.mxu1 %v5973_v0 }
 0x12a   : > { %5552 = vmatmul.mubr.msk.f32.gmra.mrb[2].mxu0 %vm219_vm1, %v5550_v3  ;;  %5554 = vmatmul.mubr.msk.f32.gmra.mrb[2].mxu1 %vm219_vm1, %v5550_v3 }
 0x12b   : > { %3728 = vmatprep.mubr.f32.mxu0 %v5973_v0  ;;  %3805 = vmatprep.mubr.f32.mxu1 %v5973_v0 }
 0x12e   : > { %5557 = vmatmul.mubr.msk.f32.vlgmr.msra.gmra.mrb[0].mxu0 %vm219_vm1, %v5555_v4  ;;  %5559 = vmatmul.mubr.msk.f32.vlgmr.msra.gmra.mrb[0].mxu1 %vm219_vm1, %v5555_v4 }
 0x12f   : > { %3836 = vmatpush1.msra.mxu0 %v6179_v21  ;;  %3913 = vmatpush1.msra.mxu1 %v6183_v22  ;;  %v5568_v21 = vld [vmem:[%s6852_s1 + $0x158] sm:$0xff]  ;;  %v5573_v22 = vld [vmem:[%s6852_s1 + $0x160] sm:$0xff] }
 0x130   : > { %4006 = vmatprep.subr.mxu0 %v6237_v35  ;;  %4083 = vmatprep.subr.mxu1 %v6233_v34  ;;  %v5586_v34 = vld [vmem:[%s6852_s1 + $0x188] sm:$0xff]  ;;  %v5591_v35 = vld [vmem:[%s6852_s1 + $0x190] sm:$0xff] }
 0x131   : > { %3734 = vmatprep.mubr.f32.mxu0 %v5973_v0  ;;  %3811 = vmatprep.mubr.f32.mxu1 %v5973_v0 }
 0x132   : > { %5558 = vmatmul.mubr.msk.f32.gmra.mrb[2].mxu0 %vm219_vm1, %v5556_v11  ;;  %5560 = vmatmul.mubr.msk.f32.gmra.mrb[2].mxu1 %vm219_vm1, %v5556_v11 }
 0x133   : > { %3899 = vmatprep.mubr.f32.mxu0 %v5973_v0  ;;  %3976 = vmatprep.mubr.f32.mxu1 %v5973_v0 }
 0x136   : > { %5563 = vmatmul.mubr.msk.f32.vlgmr.msra.gmra.mrb[0].mxu0 %vm219_vm1, %v5561_v12  ;;  %5565 = vmatmul.mubr.msk.f32.vlgmr.msra.gmra.mrb[0].mxu1 %vm219_vm1, %v5561_v12 }
 0x137   : > { %4007 = vmatpush1.msra.mxu0 %v6218_v31  ;;  %4084 = vmatpush1.msra.mxu1 %v6222_v32  ;;  %v5580_v31 = vld [vmem:[%s6852_s1 + $0x178] sm:$0xff]  ;;  %v5585_v32 = vld [vmem:[%s6852_s1 + $0x180] sm:$0xff] }
 0x138   : > { %4177 = vmatprep.subr.mxu0 %v6272_v45  ;;  %4254 = vmatprep.subr.mxu1 %v6268_v44  ;;  %v5598_v44 = vld [vmem:[%s6852_s1 + $0x1a8] sm:$0xff] }
 0x139   : > { %3905 = vmatprep.mubr.f32.mxu0 %v5973_v0  ;;  %3982 = vmatprep.mubr.f32.mxu1 %v5973_v0 }
 0x13a   : > { %5564 = vmatmul.mubr.msk.f32.gmra.mrb[2].mxu0 %vm219_vm1, %v5562_v13  ;;  %5566 = vmatmul.mubr.msk.f32.gmra.mrb[2].mxu1 %vm219_vm1, %v5562_v13 }
 0x13b   : > { %4070 = vmatprep.mubr.f32.mxu0 %v5973_v0  ;;  %4147 = vmatprep.mubr.f32.mxu1 %v5973_v0 }
 0x13e   : > { %5569 = vmatmul.mubr.msk.f32.vlgmr.msra.gmra.mrb[0].mxu0 %vm219_vm1, %v5567_v14  ;;  %5571 = vmatmul.mubr.msk.f32.vlgmr.msra.gmra.mrb[0].mxu1 %vm219_vm1, %v5567_v14 }
 0x13f   : > { %4178 = vmatpush1.msra.mxu0 %v6253_v41  ;;  %4255 = vmatpush1.msra.mxu1 %v6257_v42  ;;  %v5592_v41 = vld [vmem:[%s6852_s1 + $0x198] sm:$0xff]  ;;  %v5597_v42 = vld [vmem:[%s6852_s1 + $0x1a0] sm:$0xff] }
 0x140   : > { %4348 = vmatprep.subr.mxu0 %v6307_v55  ;;  %4425 = vmatprep.subr.mxu1 %v6303_v54 }
 0x141   : > { %4076 = vmatprep.mubr.f32.mxu0 %v5973_v0  ;;  %4153 = vmatprep.mubr.f32.mxu1 %v5973_v0 }
 0x142   : > { %5570 = vmatmul.mubr.msk.f32.gmra.mrb[2].mxu0 %vm219_vm1, %v5568_v21  ;;  %5572 = vmatmul.mubr.msk.f32.gmra.mrb[2].mxu1 %vm219_vm1, %v5568_v21 }
 0x143   : > { %4241 = vmatprep.mubr.f32.mxu0 %v5973_v0  ;;  %4318 = vmatprep.mubr.f32.mxu1 %v5973_v0 }
 0x146   : > { %5575 = vmatmul.mubr.msk.f32.vlgmr.msra.gmra.mrb[0].mxu0 %vm219_vm1, %v5573_v22  ;;  %5577 = vmatmul.mubr.msk.f32.vlgmr.msra.gmra.mrb[0].mxu1 %vm219_vm1, %v5573_v22 }
 0x147   : > { %4349 = vmatpush1.msra.mxu0 %v6288_v51  ;;  %4426 = vmatpush1.msra.mxu1 %v6292_v52 }
 0x148   : > { %4519 = vmatprep.subr.mxu0 %v6342_v8  ;;  %4596 = vmatprep.subr.mxu1 %v6338_v7 }
 0x149   : > { %4247 = vmatprep.mubr.f32.mxu0 %v5973_v0  ;;  %4324 = vmatprep.mubr.f32.mxu1 %v5973_v0 }
 0x14a   : > { %5576 = vmatmul.mubr.msk.f32.gmra.mrb[2].mxu0 %vm219_vm1, %v5574_v24  ;;  %5578 = vmatmul.mubr.msk.f32.gmra.mrb[2].mxu1 %vm219_vm1, %v5574_v24 }
 0x14b   : > { %4412 = vmatprep.mubr.f32.mxu0 %v5973_v0  ;;  %4489 = vmatprep.mubr.f32.mxu1 %v5973_v0 }
 0x14e   : > { %5581 = vmatmul.mubr.msk.f32.vlgmr.msra.gmra.mrb[0].mxu0 %vm219_vm1, %v5579_v25  ;;  %5583 = vmatmul.mubr.msk.f32.vlgmr.msra.gmra.mrb[0].mxu1 %vm219_vm1, %v5579_v25 }
 0x14f   : > { %4520 = vmatpush1.msra.mxu0 %v6323_v61  ;;  %4597 = vmatpush1.msra.mxu1 %v6327_v62 }
 0x150   : > { %4690 = vmatprep.subr.mxu0 %v6377_v26  ;;  %4767 = vmatprep.subr.mxu1 %v6373_v23 }
 0x151   : > { %4418 = vmatprep.mubr.f32.mxu0 %v5973_v0  ;;  %4495 = vmatprep.mubr.f32.mxu1 %v5973_v0 }
 0x152   : > { %5582 = vmatmul.mubr.msk.f32.gmra.mrb[2].mxu0 %vm219_vm1, %v5580_v31  ;;  %5584 = vmatmul.mubr.msk.f32.gmra.mrb[2].mxu1 %vm219_vm1, %v5580_v31 }
 0x153   : > { %4583 = vmatprep.mubr.f32.mxu0 %v5973_v0  ;;  %4660 = vmatprep.mubr.f32.mxu1 %v5973_v0 }
 0x156   : > { %5587 = vmatmul.mubr.msk.f32.vlgmr.msra.gmra.mrb[0].mxu0 %vm219_vm1, %v5585_v32  ;;  %5589 = vmatmul.mubr.msk.f32.vlgmr.msra.gmra.mrb[0].mxu1 %vm219_vm1, %v5585_v32 }
 0x157   : > { %4691 = vmatpush1.msra.mxu0 %v6358_v18  ;;  %4768 = vmatpush1.msra.mxu1 %v6362_v19 }
 0x158   : > { %4861 = vmatprep.subr.mxu0 %v6412_v40  ;;  %4938 = vmatprep.subr.mxu1 %v6408_v39 }
 0x159   : > { %4589 = vmatprep.mubr.f32.mxu0 %v5973_v0  ;;  %4666 = vmatprep.mubr.f32.mxu1 %v5973_v0 }
 0x15a   : > { %5588 = vmatmul.mubr.msk.f32.gmra.mrb[2].mxu0 %vm219_vm1, %v5586_v34  ;;  %5590 = vmatmul.mubr.msk.f32.gmra.mrb[2].mxu1 %vm219_vm1, %v5586_v34 }
 0x15b   : > { %4754 = vmatprep.mubr.f32.mxu0 %v5973_v0  ;;  %4831 = vmatprep.mubr.f32.mxu1 %v5973_v0 }
 0x15e   : > { %5593 = vmatmul.mubr.msk.f32.vlgmr.msra.gmra.mrb[0].mxu0 %vm219_vm1, %v5591_v35  ;;  %5595 = vmatmul.mubr.msk.f32.vlgmr.msra.gmra.mrb[0].mxu1 %vm219_vm1, %v5591_v35 }
 0x15f   : > { %4862 = vmatpush1.msra.mxu0 %v6393_v36  ;;  %4939 = vmatpush1.msra.mxu1 %v6397_v37 }
 0x160   : > { %4760 = vmatprep.mubr.f32.mxu0 %v5973_v0  ;;  %4837 = vmatprep.mubr.f32.mxu1 %v5973_v0 }
 0x162   : > { %5594 = vmatmul.mubr.msk.f32.gmra.mrb[2].mxu0 %vm219_vm1, %v5592_v41  ;;  %5596 = vmatmul.mubr.msk.f32.gmra.mrb[2].mxu1 %vm219_vm1, %v5592_v41 }
 0x163   : > { %4925 = vmatprep.mubr.f32.mxu0 %v5973_v0  ;;  %5002 = vmatprep.mubr.f32.mxu1 %v5973_v0 }
 0x164   : > { %v5028_v45 = vpop.permute.xlu0 %5027  ;;  %v5033_v18 = vpop.permute.xlu1 %5032 }
 0x166   : > { %5599 = vmatmul.mubr.msk.f32.vlgmr.msra.gmra.mrb[0].mxu0 %vm219_vm1, %v5597_v42  ;;  %5601 = vmatmul.mubr.msk.f32.vlgmr.msra.gmra.mrb[0].mxu1 %vm219_vm1, %v5597_v42 }
 0x167   : > { %4931 = vmatprep.mubr.f32.mxu0 %v5973_v0  ;;  %5008 = vmatprep.mubr.f32.mxu1 %v5973_v0 }
 0x16a   : > { %5600 = vmatmul.mubr.msk.f32.gmra.mrb[2].mxu0 %vm219_vm1, %v5598_v44  ;;  %5602 = vmatmul.mubr.msk.f32.gmra.mrb[2].mxu1 %vm219_vm1, %v5598_v44  ;;  %vm5367_vm1 = vcmask 122880  }
 0x239   : > { %v4927_v51 = vpop.f32.mrb[0].mxu0  ;;  %v5004_v52 = vpop.f32.mrb[0].mxu1 }
 0x23a   : > { %v5035_v54 = vadd.f32 %v5028_v45, %v4927_v51  ;;  %v5037_v55 = vadd.f32 %v5028_v45, %v5004_v52  ;;  %v4929_v61 = vpop.f32.mrb[1].mxu0  ;;  %v5006_v62 = vpop.f32.mrb[1].mxu1 }
 0x23b   : > { %v5036_v7 = vadd.f32 %v5028_v45, %v4929_v61  ;;  %v5038_v8 = vadd.f32 %v5028_v45, %v5006_v62 }
 0x23c   : > { %v5043_v19 = vadd.f32 3.0, %v5035_v54  ;;  %v5045_v0 = vadd.f32 3.0, %v5037_v55 }
 0x23d   : > { %v5044_v23 = vadd.f32 3.0, %v5036_v7  ;;  %v5046_v26 = vadd.f32 3.0, %v5038_v8  ;;  %v4933_v36 = vpop.f32.mrb[2].mxu0  ;;  %v5010_v37 = vpop.f32.mrb[2].mxu1 }
 0x23e   : > { %v5051_v39 = vmax.f32 %v5043_v19, 0.0  ;;  %v5053_v40 = vmax.f32 %v5045_v0, 0.0  ;;  %v5039_v27 = vadd.f32 %v5033_v18, %v4933_v36  ;;  %v5041_v28 = vadd.f32 %v5033_v18, %v5010_v37  ;;  %v4935_v29 = vpop.f32.mrb[3].mxu0  ;;  %v5012_v30 = vpop.f32.mrb[3].mxu1 }
 0x23f   : > { %v5052_v33 = vmax.f32 %v5044_v23, 0.0  ;;  %v5054_v38 = vmax.f32 %v5046_v26, 0.0  ;;  %v5040_v43 = vadd.f32 %v5033_v18, %v4935_v29  ;;  %v5042_v46 = vadd.f32 %v5033_v18, %v5012_v30 }
 0x240   : > { %v5059_v47 = vmin.f32 %v5051_v39, 6.0  ;;  %v5061_v48 = vmin.f32 %v5053_v40, 6.0  ;;  %v5047_v49 = vadd.f32 3.0, %v5039_v27  ;;  %v5049_v50 = vadd.f32 3.0, %v5041_v28 }
 0x241   : > { %v5060_v53 = vmin.f32 %v5052_v33, 6.0  ;;  %v5062_v56 = vmin.f32 %v5054_v38, 6.0  ;;  %v5048_v57 = vadd.f32 3.0, %v5040_v43  ;;  %v5050_v58 = vadd.f32 3.0, %v5042_v46 }
 0x242   : > { %v5067_v59 = vmul.f32 %v5059_v47, %v5035_v54  ;;  %v5069_v60 = vmul.f32 %v5061_v48, %v5037_v55  ;;  %v5055_v63 = vmax.f32 %v5047_v49, 0.0  ;;  %v5057_v9 = vmax.f32 %v5049_v50, 0.0 }
 0x243   : > { %v5068_v10 = vmul.f32 %v5060_v53, %v5036_v7  ;;  %v5070_v6 = vmul.f32 %v5062_v56, %v5038_v8  ;;  %v5056_v15 = vmax.f32 %v5048_v57, 0.0  ;;  %v5058_v16 = vmax.f32 %v5050_v58, 0.0 }
 0x244   : > { %v5063_v17 = vmin.f32 %v5055_v63, 6.0  ;;  %v5065_v20 = vmin.f32 %v5057_v9, 6.0  ;;  %v5075_v3 = vmul.f32 0.16666667, %v5067_v59  ;;  %v5077_v4 = vmul.f32 0.16666667, %v5069_v60 }
 0x245   : > { %v5064_v1 = vmin.f32 %v5056_v15, 6.0  ;;  %v5066_v2 = vmin.f32 %v5058_v16, 6.0  ;;  %v5076_v13 = vmul.f32 0.16666667, %v5068_v10  ;;  %v5078_v14 = vmul.f32 0.16666667, %v5070_v6 }
 0x246   : > { %v5071_v11 = vmul.f32 %v5063_v17, %v5039_v27  ;;  %v5073_v12 = vmul.f32 %v5065_v20, %v5041_v28  ;;  %v5083_v34 = vmax.f32 %v5075_v3, 0.0  ;;  %v5085_v35 = vmax.f32 %v5077_v4, 0.0 }
 0x247   : > { %v5072_v21 = vmul.f32 %v5064_v1, %v5040_v43  ;;  %v5074_v22 = vmul.f32 %v5066_v2, %v5042_v46  ;;  %v5084_v44 = vmax.f32 %v5076_v13, 0.0  ;;  %v5086_v45 = vmax.f32 %v5078_v14, 0.0 }
 0x248   : > { %v5079_v24 = vmul.f32 0.16666667, %v5071_v11  ;;  %v5081_v25 = vmul.f32 0.16666667, %v5073_v12 }
 0x249   : > { %v5080_v31 = vmul.f32 0.16666667, %v5072_v21  ;;  %v5082_v32 = vmul.f32 0.16666667, %v5074_v22 }
 0x24a   : > { %v5087_v41 = vmax.f32 %v5079_v24, 0.0  ;;  %v5089_v42 = vmax.f32 %v5081_v25, 0.0 }
 0x24b   : > { %v5088_v51 = vmax.f32 %v5080_v31, 0.0  ;;  %v5090_v52 = vmax.f32 %v5082_v32, 0.0 }
 0x24c   : > { %v5091_v54 = vmax.f32 %v5083_v34, %v5087_v41  ;;  %v5105_v55 = vmax.f32 %v5085_v35, %v5089_v42 }
 0x24d   : > { %v5098_v61 = vmax.f32 %v5084_v44, %v5088_v51  ;;  %v5112_v62 = vmax.f32 %v5086_v45, %v5090_v52 }
 0x24e   : > { %v5092_v7 = vrot.slane %v5091_v54, 4  ;;  %v5106_v8 = vrot.slane %v5105_v55, 4 }
 0x24f   : > { %v5099_v18 = vrot.slane %v5098_v61, 4  ;;  %v5113_v19 = vrot.slane %v5112_v62, 4 }
 0x250   : > { %v5093_v0 = vmax.f32 %v5091_v54, %v5092_v7  ;;  %v5107_v23 = vmax.f32 %v5105_v55, %v5106_v8 }
 0x251   : > { %v5100_v26 = vmax.f32 %v5098_v61, %v5099_v18  ;;  %v5114_v36 = vmax.f32 %v5112_v62, %v5113_v19 }
 0x252   : > { %v5094_v37 = vrot.slane %v5093_v0, 2  ;;  %v5108_v39 = vrot.slane %v5107_v23, 2 }
 0x253   : > { %v5101_v40 = vrot.slane %v5100_v26, 2  ;;  %v5115_v27 = vrot.slane %v5114_v36, 2 }
 0x254   : > { %v5095_v28 = vmax.f32 %v5093_v0, %v5094_v37  ;;  %v5109_v29 = vmax.f32 %v5107_v23, %v5108_v39 }
 0x255   : > { %v5102_v30 = vmax.f32 %v5100_v26, %v5101_v40  ;;  %v5116_v33 = vmax.f32 %v5114_v36, %v5115_v27 }
 0x256   : > { %v5096_v38 = vrot.slane %v5095_v28, 1  ;;  %v5110_v43 = vrot.slane %v5109_v29, 1 }
 0x257   : > { %v5103_v46 = vrot.slane %v5102_v30, 1  ;;  %v5117_v47 = vrot.slane %v5116_v33, 1 }
 0x258   : > { %v5097_v48 = vmax.f32 %v5095_v28, %v5096_v38  ;;  %v5111_v49 = vmax.f32 %v5109_v29, %v5110_v43  ;;  %v5992_v43 = vmov 1966171168  }
 0x259   : > { %v5104_v50 = vmax.f32 %v5102_v30, %v5103_v46  ;;  %v5118_v53 = vmax.f32 %v5116_v33, %v5117_v47  ;;  %v5183_v46 = vunpack.c.l.s4 %v5992_v43 }
 0x25a   : > { %v5119_v56 = vsub.f32 %v5083_v34, %v5097_v48  ;;  %v5123_v57 = vsub.f32 %v5087_v41, %v5097_v48  ;;  %v5121_v58 = vsub.f32 %v5085_v35, %v5111_v49  ;;  %v5125_v59 = vsub.f32 %v5089_v42, %v5111_v49 }
 0x25b   : > { %v5120_v60 = vsub.f32 %v5084_v44, %v5104_v50  ;;  %v5124_v63 = vsub.f32 %v5088_v51, %v5104_v50  ;;  %v5122_v9 = vsub.f32 %v5086_v45, %v5118_v53  ;;  %v5126_v10 = vsub.f32 %v5090_v52, %v5118_v53 }
 0x25c   : > { %v5127_v6 = vmul.f32 1.442695, %v5119_v56  ;;  %v5135_v15 = vmul.f32 1.442695, %v5123_v57  ;;  %v5131_v16 = vmul.f32 1.442695, %v5121_v58  ;;  %v5184_v47 = vunpack.c.0.s8 %v5183_v46 }
 0x25d   : > { %v5139_v17 = vmul.f32 1.442695, %v5125_v59  ;;  %v5129_v20 = vmul.f32 1.442695, %v5120_v60  ;;  %v5137_v1 = vmul.f32 1.442695, %v5124_v63 }
 0x25e   : > { %5885 = vpow2.f32 %v5127_v6  ;;  %v5133_v2 = vmul.f32 1.442695, %v5122_v9  ;;  %v5141_v3 = vmul.f32 1.442695, %v5126_v10  ;;  %v5186_v48 = vshrl.u32 %v209_v5, 7 }
 0x25f   : > { %5887 = vpow2.f32 %v5135_v15  ;;  %v5171_v10 = vld [vmem:[%s6854_s3] sm:$0xf] }
 0x260   : > { %5889 = vpow2.f32 %v5131_v16  ;;  %v5187_v53 = vsub.s32 %v5184_v47, %v5186_v48  ;;  %v5213_v6 = vsub.s32 1, %v5186_v48  ;;  %v5221_v16 = vsub.s32 3, %v5186_v48 }
 0x261   : > { %5891 = vpow2.f32 %v5139_v17  ;;  %v5209_v5 = vsub.s32 0, %v5186_v48  ;;  %v5217_v17 = vsub.s32 2, %v5186_v48 }
 0x262   : > { %5893 = vpow2.f32 %v5129_v20 }
 0x263   : > { %5895 = vpow2.f32 %v5137_v1 }
 0x264   : > { %5897 = vpow2.f32 %v5133_v2 }
 0x265   : > { %5899 = vpow2.f32 %v5141_v3 }
 0x268   : > { %v5886_v4 = vpop.eup %5885 }
 0x269   : > { %v5888_v11 = vpop.eup %5887 }
 0x26a   : > { %v5890_v12 = vpop.eup %5889  ;;  %v5143_v13 = vadd.f32 %v5888_v11, %v5886_v4  ;;  %v5609_v14 = vpack.c.bf16 %v5888_v11, %v5886_v4 }
 0x26b   : > { %v5892_v21 = vpop.eup %5891 }
 0x26c   : > { %v5894_v22 = vpop.eup %5893  ;;  %v5144_v24 = vrot.slane %v5143_v13, 4  ;;  %v5157_v25 = vadd.f32 %v5892_v21, %v5890_v12  ;;  %v5613_v31 = vpack.c.bf16 %v5892_v21, %v5890_v12 }
 0x26d   : > { %v5896_v32 = vpop.eup %5895 }
 0x26e   : > { %v5898_v34 = vpop.eup %5897  ;;  %v5145_v35 = vadd.f32 %v5144_v24, %v5143_v13  ;;  %v5158_v41 = vrot.slane %v5157_v25, 4  ;;  %v5150_v42 = vadd.f32 %v5896_v32, %v5894_v22  ;;  %v5607_v44 = vpack.c.bf16 %v5896_v32, %v5894_v22 }
 0x26f   : > { %v5900_v45 = vpop.eup %5899 }
 0x270   : > { %v5146_v51 = vrot.slane %v5145_v35, 2  ;;  %v5159_v52 = vadd.f32 %v5158_v41, %v5157_v25  ;;  %v5151_v54 = vrot.slane %v5150_v42, 4  ;;  %v5164_v55 = vadd.f32 %v5900_v45, %v5898_v34  ;;  %5608 = vmatprep.subr.bf16.mxu1 %v5607_v44 }
 0x271   : > { %v5611_v61 = vpack.c.bf16 %v5900_v45, %v5898_v34  ;;  %5610 = vmatpush1.bf16.xpose.msra.mxu1 %v5609_v14 }
 0x272   : > { %v5147_v62 = vadd.f32 %v5146_v51, %v5145_v35  ;;  %v5160_v7 = vrot.slane %v5159_v52, 2  ;;  %v5152_v8 = vadd.f32 %v5151_v54, %v5150_v42  ;;  %v5165_v18 = vrot.slane %v5164_v55, 4 }
 0x273   : > { %5612 = vmatprep.subr.bf16.mxu0 %v5611_v61 }
 0x274   : > { %v5148_v19 = vrot.slane %v5147_v62, 1  ;;  %v5161_v0 = vadd.f32 %v5160_v7, %v5159_v52  ;;  %v5153_v23 = vrot.slane %v5152_v8, 2  ;;  %v5166_v26 = vadd.f32 %v5165_v18, %v5164_v55  ;;  %5614 = vmatpush1.bf16.xpose.msra.mxu0 %v5613_v31 }
 0x276   : > { %v5149_v36 = vadd.f32 %v5148_v19, %v5147_v62  ;;  %v5162_v37 = vrot.slane %v5161_v0, 1  ;;  %v5154_v39 = vadd.f32 %v5153_v23, %v5152_v8  ;;  %v5167_v40 = vrot.slane %v5166_v26, 2 }
 0x278   : > { %v5163_v27 = vadd.f32 %v5162_v37, %v5161_v0  ;;  %v5155_v28 = vrot.slane %v5154_v39, 1  ;;  %v5168_v29 = vadd.f32 %v5167_v40, %v5166_v26  ;;  %5901 = vrcp.f32 %v5149_v36 }
 0x27a   : > { %v5156_v30 = vadd.f32 %v5155_v28, %v5154_v39  ;;  %v5169_v33 = vrot.slane %v5168_v29, 1  ;;  %5903 = vrcp.f32 %v5163_v27 }
 0x27c   : > { %5905 = vrcp.f32 %v5156_v30  ;;  %v5170_v38 = vadd.f32 %v5169_v33, %v5168_v29 }
 0x27e   : > { %5907 = vrcp.f32 %v5170_v38 }
 0x282   : > { %v5902_v49 = vpop.eup %5901 }
 0x284   : > { %v5904_v50 = vpop.eup %5903 }
 0x286   : > { %v5906_v56 = vpop.eup %5905 }
 0x287   : > { %v5180_v57 = vcombine.low %v5902_v49, %v5906_v56 }
 0x288   : > { %v5908_v58 = vpop.eup %5907 }
 0x289   : > { %v5181_v59 = vcombine.low %v5904_v50, %v5908_v58  ;;  %v5188_v60 = vrot.slane %v5180_v57, %v5187_v53 }
 0x28b   : > { %v5195_v63 = vrot.slane %v5181_v59, %v5187_v53 }
 0x28d   : > { %v5196_v9 = vcombine.low %v5188_v60, %v5195_v63 }
 0x28f   : > { %v5203_v15 = vrot.slane %v5196_v9, %v5187_v53 }
 0x291   : > { %v5205_v20 = vmul.f32 %v5203_v15, %v5171_v10 }
 0x293   : > { %v5214_v1 = vrot.slane %v5205_v20, %v5213_v6  ;;  %v5222_v2 = vrot.slane %v5205_v20, %v5221_v16  ;;  %v5210_v3 = vrot.slane %v5205_v20, %v5209_v5  ;;  %v5218_v4 = vrot.slane %v5205_v20, %v5217_v17 }
 0x295   : > { %5291 = vmatprep.mubr.f32.mxu1 %v5214_v1  ;;  %5361 = vmatprep.mubr.f32.mxu0 %v5222_v2 }
 0x296   : > { %5292 = vmatmul.mubr.f32.vlgmr.msra.gmra.mrb[4].mxu1 %v5210_v3  ;;  %5362 = vmatmul.mubr.f32.vlgmr.msra.gmra.mrb[4].mxu0 %v5218_v4 }
 0x369   : > { %v5293_v11 = vpop.f32.mrb[4].mxu1  ;;  %v5363_v12 = vpop.f32.mrb[4].mxu0 }
 0x36a   : > { %v5364_v13 = vadd.f32 %v5363_v12, %v5293_v11  ;;  %v5295_v14 = vpop.f32.mrb[5].mxu1  ;;  %v5365_v21 = vpop.f32.mrb[5].mxu0 }
 0x36c   : > { %5368 = vst.msk [vmem:[%s189_s29] sm:$0x1] %vm5367_vm1, %v5364_v13 }
 0x36d   : > { %5922 = shalt.err (!%p5919_p3)
}
 0x36e   : > { %s5923_s12 = scalar_lea.hbm %s6809_s7, 16  ;;  %s5927_s20 = scalar_lea.hbm %s6855_s4, 32 }
 0x36f   : > { %p5924_p4 = scmp.ne.s32.totalorder %s6809_s7, %s5923_s12  ;;  %p5928_p9 = scmp.lt.u32.totalorder %s6809_s7, %s6855_s4 }
 0x370   : > { %p5929_p10 = scmp.lt.u32.totalorder %s5927_s20, %s5923_s12  ;;  %p5931_p12 = scmp.lt.u32.totalorder %s5923_s12, %s6809_s7 }
 0x371   : > { %p5925_p7 = pnand %p5924_p4, %p6057_p5 }
 0x372   : > { %p5930_p11 = por %p5929_p10, %p5928_p9 }
 0x373   : > { %p5926_p8 = pneg %p5925_p7 }
 0x374   : > { %p5932_p13 = por %p5931_p12, %p5930_p11 }
 0x376   : > { %p5933_p0 = pnand %p5932_p13, %p5926_p8 }
 0x378   : > { %5936 = shalt.err (!%p5933_p0)
}
 0x379   : > { %5824 = dma.vmem_to_hbm [thread:$0]  (%p6057_p5), %s6811_s30, 16, %s6809_s7, %s5370_s19  }
 0x37a PF: > { %p5830_p1 = scmp.ge.s32.totalorder %s5971_s18, 2  ;;  %s5394_s27 = sand.u32 1, %s5959_s15  }
 0x37b   : > { %s5395_s28 = scalar_lea.sflag [#allocation3], %s5394_s27 }
 0x37c   : > { %p5827_p2 = pnand %p5830_p1, %p6061_p6 }
 0x37e   : > { %5954 = dma.done.wait (!%p5827_p2), %s5395_s28, 16  }
 0x37f   : > { %5956 = vsyncadd (!%p5827_p2), %s5395_s28, 4294967280  ;;  %p14_p3 = scmp.ge.s32.totalorder %s6044_s21, 4   ;;  %s6858_s15 = smov %s5963_s16 }
 0x380   : > { %s6859_s16 = smov %s5967_s17  ;;  %s6860_s17 = smov %s6055_s24 }
 0x381   : > { %s6861_s18 = smov %s6044_s21  ;;  %16 = sbr.rel (!%p14_p3) target bundleno = 3 (0x3), region = 97 }
 0x388   :  { %5399 = vsyncpa [#allocation3], 1 }
 0x389   :  { %5401 = vsyncpa [#allocation3 + $0x1], 1 }

</bundles_post_ra>
